<compile_context>
chip_gen: v6e
topology: v6e:2x2x1
jax: 0.10.0
libtpu: 0.0.40
codegen_flags: <defaults>
</compile_context>

<pallas_src>
import functools

import jax
import jax.numpy as jnp
from jax import lax
from jax.experimental import pallas as pl
from jax.experimental.pallas import tpu as pltpu


def _sent_atten_kernel(
    # inputs
    x_ref,      # (1, S, 2I)  bf16  [x_l | x_r]
    h0_ref,     # (1, 1, SW)  f32   [h_l | h_r | 0]
    c0_ref,     # (1, 1, SW)  f32
    wih_ref,    # (2I, 4GW)   bf16  block-diag, gate layout [i,f,o,g], g cols x2
    whh_ref,    # (SW, 4GW)   bf16
    b_ref,      # (1, 4GW)    f32
    wa_ref,     # (SW, SW)    bf16  block-diag attention weights
    ba_ref,     # (1, SW)     f32
    ctx_ref,    # (1, SW)     f32   [ctx_l | ctx_r | 0]
    wlin_ref,   # (7, C)      f32
    blin_ref,   # (1, C)      f32
    # outputs
    logp_ref,   # (1, 1, C)
    h_out_ref,  # (1, 1, SW)
    c_out_ref,  # (1, 1, SW)
    # scratch
    seq_ref,    # (S, SW) f32 VMEM
    *,
    H: int,
):
    S = x_ref.shape[1]
    GW = b_ref.shape[-1] // 4          # 128-aligned per-gate lane width

    # ---- hoisted input projection: one MXU matmul for all timesteps and
    # both branches (bf16 operands, f32 accumulation) ----
    gates_x = (
        jnp.dot(x_ref[0], wih_ref[...], preferred_element_type=jnp.float32)
        + b_ref[...]
    )                                                    # (S, 4GW) f32

    whh = whh_ref[...]                                   # (SW, 4GW) bf16
    h = h0_ref[0]                                        # (1, SW) f32
    c = c0_ref[0]                                        # (1, SW) f32

    # ---- fused left+right LSTM recurrence, statically unrolled over S ----
    for t in range(S):
        pre = gates_x[t:t + 1, :] + jnp.dot(
            h.astype(jnp.bfloat16), whh, preferred_element_type=jnp.float32
        )                                                # (1, 4GW) f32
        # one wide sigmoid covers i, f, o AND g (tanh(x) = 2*sigmoid(2x) - 1,
        # g columns pre-scaled by 2 in fuse_params).
        sig = jax.nn.sigmoid(pre)
        i_g = sig[:, 0 * GW:1 * GW]                      # 128-lane aligned slices
        f_g = sig[:, 1 * GW:2 * GW]
        o_g = sig[:, 2 * GW:3 * GW]
        g_g = 2.0 * sig[:, 3 * GW:4 * GW] - 1.0
        c = f_g * c + i_g * g_g
        h = o_g * jnp.tanh(c)
        seq_ref[pl.ds(t, 1), :] = h                      # off the serial chain

    h_out_ref[0] = h
    c_out_ref[0] = c

    seq = seq_ref[...]                                   # (S, SW)

    # ---- attention (both branches at once, block-diag Wa) ----
    u = jnp.tanh(
        jnp.dot(seq.astype(jnp.bfloat16), wa_ref[...],
                preferred_element_type=jnp.float32) + ba_ref[...]
    )                                                    # (S, SW)
    prod = u * ctx_ref[...]                              # ctx pad lanes are 0
    lane = lax.broadcasted_iota(jnp.int32, prod.shape, 1)
    left = lane < H
    score_l = jnp.sum(jnp.where(left, prod, 0.0), axis=-1, keepdims=True)  # (S,1)
    score_r = jnp.sum(jnp.where(left, 0.0, prod), axis=-1, keepdims=True)  # (S,1)

    def softmax_seq(s):                                  # softmax over S axis
        m = jnp.max(s, axis=0, keepdims=True)
        e = jnp.exp(s - m)
        return e / jnp.sum(e, axis=0, keepdims=True)     # exact division

    alpha = jnp.where(left, softmax_seq(score_l), softmax_seq(score_r))  # (S,SW)
    lr = jnp.sum(alpha * seq, axis=0, keepdims=True)     # (1, SW) = [l | r | 0]

    l_h = lr[:, 0:H]
    r_h = lr[:, H:2 * H]

    # ---- fused pairwise similarity features (get_last_layer, fuse=True) ----
    # TODO(synk): sypt_utils not provided; standard sklearn-style kernels used.
    eps = jnp.float32(1e-8)
    d = l_h - r_h
    ad = jnp.abs(d)
    stacked = jnp.concatenate(
        [l_h * r_h,                                           # dot
         l_h * l_h,                                           # ||l||^2
         r_h * r_h,                                           # ||r||^2
         d * d,                                               # sq distance
         ad,                                                  # L1
         d * d / (jnp.abs(l_h) + jnp.abs(r_h) + eps)],        # chi-square terms
        axis=0)                                               # (6, H)
    sums = jnp.sum(stacked, axis=-1, keepdims=True)           # (6, 1)
    dot_v, ll, rr, sq, l1, chi_s = (sums[k:k + 1] for k in range(6))

    inv_h = jnp.float32(1.0 / H)
    cos = dot_v / jnp.maximum(jnp.sqrt(ll * rr), eps)
    euc = jnp.sqrt(sq + eps)
    mean_l1 = l1 * inv_h
    sig_k = jnp.tanh(dot_v * inv_h + 1.0)
    chi = jnp.exp(-chi_s)
    rbf = jnp.exp(-sq * inv_h)

    merged = jnp.concatenate([cos, euc, dot_v, mean_l1, sig_k, chi, rbf],
                             axis=1)                          # (1, 7)

    # dropout skipped (eval mode) -> final linear + log_softmax
    logits = (jnp.dot(merged, wlin_ref[...], preferred_element_type=jnp.float32)
              + blin_ref[...])                                # (1, C)
    logp_ref[0] = jax.nn.log_softmax(logits, axis=-1)


@functools.partial(jax.jit, static_argnames=("hidden_size",))
def sent_atten_rnn(x_l, x_r, h0_l, c0_l, h0_r, c0_r, fused, *, hidden_size):
    """Process P independent sentence pairs (each with batch_size == 1) in one
    launch via a parallel grid axis."""
    P, S, B, I = x_l.shape
    assert B == 1, "fuse=True path requires batch_size == 1 per pair"
    H = hidden_size
    GW = fused["b"].shape[-1] // 4
    SW = fused["whh"].shape[0]
    C = fused["blin"].shape[-1]

    # squeeze B=1 and concatenate branches along the feature (lane) axis
    x_cat = jnp.concatenate([x_l[:, :, 0, :], x_r[:, :, 0, :]],
                            axis=-1).astype(jnp.bfloat16)          # (P, S, 2I)
    pad = jnp.zeros((P, 1, SW - 2 * H), jnp.float32)
    h0 = jnp.concatenate([h0_l, h0_r, pad], axis=-1)               # (P, 1, SW)
    c0 = jnp.concatenate([c0_l, c0_r, pad], axis=-1)               # (P, 1, SW)

    kernel = functools.partial(_sent_atten_kernel, H=H)
    grid_spec = pltpu.PrefetchScalarGridSpec(
        num_scalar_prefetch=0,
        grid=(P,),
        in_specs=[
            # per-pair data (pipelined across grid steps)
            pl.BlockSpec((1, S, 2 * I), lambda p: (p, 0, 0)),      # x
            pl.BlockSpec((1, 1, SW), lambda p: (p, 0, 0)),         # h0
            pl.BlockSpec((1, 1, SW), lambda p: (p, 0, 0)),         # c0
            # weights: constant index_map -> VMEM-resident, no re-DMA per pair
            pl.BlockSpec((2 * I, 4 * GW), lambda p: (0, 0)),       # wih
            pl.BlockSpec((SW, 4 * GW), lambda p: (0, 0)),          # whh
            pl.BlockSpec((1, 4 * GW), lambda p: (0, 0)),           # b
            pl.BlockSpec((SW, SW), lambda p: (0, 0)),              # wa
            pl.BlockSpec((1, SW), lambda p: (0, 0)),               # ba
            pl.BlockSpec((1, SW), lambda p: (0, 0)),               # ctx
            pl.BlockSpec((7, C), lambda p: (0, 0)),                # wlin
            pl.BlockSpec((1, C), lambda p: (0, 0)),                # blin
        ],
        out_specs=[
            pl.BlockSpec((1, 1, C), lambda p: (p, 0, 0)),          # log-probs
            pl.BlockSpec((1, 1, SW), lambda p: (p, 0, 0)),         # h out
            pl.BlockSpec((1, 1, SW), lambda p: (p, 0, 0)),         # c out
        ],
        scratch_shapes=[pltpu.VMEM((S, SW), jnp.float32)],
    )
    out_shape = (
        jax.ShapeDtypeStruct((P, 1, C), jnp.float32),
        jax.ShapeDtypeStruct((P, 1, SW), jnp.float32),
        jax.ShapeDtypeStruct((P, 1, SW), jnp.float32),
    )
    logp, h_out, c_out = pl.pallas_call(
        kernel,
        out_shape=out_shape,
        grid_spec=grid_spec,
        compiler_params=pltpu.CompilerParams(
            dimension_semantics=("parallel",)),   # v7x: pairs split across 2 TCs
    )(x_cat, h0, c0,
      fused["wih"], fused["whh"], fused["b"],
      fused["wa"], fused["ba"], fused["ctx"],
      fused["wlin"], fused["blin"])

    # hidden states per pair, PyTorch LSTM-like layout (num_layers=1, B=1, H)
    hidden = [
        (h_out[:, :, :H], c_out[:, :, :H]),               # left  (P, 1, H)
        (h_out[:, :, H:2 * H], c_out[:, :, H:2 * H]),     # right (P, 1, H)
    ]
    return logp, hidden


def make_params(key, ptf_hidden, sent_hidden, class_no):
    """PyTorch-layout parameters (nn.LSTM / nn.Linear conventions)."""
    H, I, C = sent_hidden, ptf_hidden, class_no
    ks = jax.random.split(key, 16)

    def lstm(k0, k1, k2, k3):
        wih = jax.random.normal(k0, (4 * H, I), jnp.float32) * 0.1
        whh = jax.random.normal(k1, (4 * H, H), jnp.float32) * 0.1
        bih = jax.random.normal(k2, (4 * H,), jnp.float32) * 0.05
        bhh = jax.random.normal(k3, (4 * H,), jnp.float32) * 0.05
        return wih, whh, bih, bhh

    wih_l, whh_l, bih_l, bhh_l = lstm(ks[0], ks[1], ks[2], ks[3])
    wih_r, whh_r, bih_r, bhh_r = lstm(ks[4], ks[5], ks[6], ks[7])

    wa_l = jax.random.normal(ks[8], (H, H), jnp.float32) * 0.1
    ba_l = jax.random.normal(ks[9], (H,), jnp.float32) * 0.05
    ctx_l = jax.random.uniform(ks[10], (H, 1), jnp.float32, -1.0, 1.0)
    wa_r = jax.random.normal(ks[11], (H, H), jnp.float32) * 0.1
    ba_r = jax.random.normal(ks[12], (H,), jnp.float32) * 0.05
    ctx_r = jax.random.uniform(ks[13], (H, 1), jnp.float32, -1.0, 1.0)

    wlin = jax.random.normal(ks[14], (C, 7), jnp.float32) * 0.1
    blin = jax.random.normal(ks[15], (C,), jnp.float32) * 0.05

    return dict(
        wih_l=wih_l, whh_l=whh_l, bih_l=bih_l, bhh_l=bhh_l,
        wih_r=wih_r, whh_r=whh_r, bih_r=bih_r, bhh_r=bhh_r,
        wa_l=wa_l, ba_l=ba_l, ctx_l=ctx_l,
        wa_r=wa_r, ba_r=ba_r, ctx_r=ctx_r,
        wlin=wlin, blin=blin,
    )


def fuse_params(p):
    """Build 128-lane-aligned block-diagonal fused weights.

    Output-gate layout: [i | f | o | g], each gate occupying a 128-aligned
    block whose lanes are [left(H) | right(H) | zeros].  The g-gate columns
    and bias are pre-scaled by 2 so tanh(x) = 2*sigmoid(2x) - 1 can be folded
    into the kernel's single wide sigmoid.  Matmul operands are pre-cast to
    bf16; biases and element-wise params stay f32.
    """
    H = p["wa_l"].shape[0]
    H2 = 2 * H
    GW = -(-H2 // 128) * 128        # padded per-gate lane width
    SW = GW                         # padded state width

    def split4(w):  # (R, 4H) with PyTorch column order [i, f, g, o]
        return w[:, 0:H], w[:, H:2 * H], w[:, 2 * H:3 * H], w[:, 3 * H:4 * H]

    def gate_block(left, right):
        # (R, H) + (R, H) -> (R, GW) laid out [left | right | zero pad]
        R = left.shape[0]
        return jnp.concatenate(
            [left, right, jnp.zeros((R, GW - H2), jnp.float32)], axis=1)

    def fuse_w(wl_t, wr_t):
        # per-branch (R, 4H) transposed weights -> block-diag (Rl+Rr, 4*GW)
        Rl, Rr = wl_t.shape[0], wr_t.shape[0]
        il, fl, gl, ol = split4(wl_t)
        ir, fr, gr, orr = split4(wr_t)
        Zl = jnp.zeros((Rl, H), jnp.float32)
        Zr = jnp.zeros((Rr, H), jnp.float32)
        top = jnp.concatenate(
            [gate_block(il, Zl), gate_block(fl, Zl),
             gate_block(ol, Zl), gate_block(2.0 * gl, Zl)], axis=1)
        bot = jnp.concatenate(
            [gate_block(Zr, ir), gate_block(Zr, fr),
             gate_block(Zr, orr), gate_block(Zr, 2.0 * gr)], axis=1)
        return jnp.concatenate([top, bot], axis=0)

    def fuse_b(bl, br):
        il, fl, gl, ol = split4(bl.reshape(1, -1))
        ir, fr, gr, orr = split4(br.reshape(1, -1))
        return jnp.concatenate(
            [gate_block(il, ir), gate_block(fl, fr),
             gate_block(ol, orr), gate_block(2.0 * gl, 2.0 * gr)], axis=1)

    wih_blk = fuse_w(p["wih_l"].T, p["wih_r"].T).astype(jnp.bfloat16)   # (2I,4GW)
    whh_blk = fuse_w(p["whh_l"].T, p["whh_r"].T)                        # (2H,4GW)
    whh_blk = jnp.concatenate(
        [whh_blk, jnp.zeros((SW - H2, 4 * GW), jnp.float32)],
        axis=0).astype(jnp.bfloat16)                                     # (SW,4GW)
    b_blk = fuse_b(p["bih_l"] + p["bhh_l"], p["bih_r"] + p["bhh_r"])     # (1,4GW)

    wa_blk = jnp.zeros((SW, SW), jnp.float32)
    wa_blk = wa_blk.at[0:H, 0:H].set(p["wa_l"].T)
    wa_blk = wa_blk.at[H:H2, H:H2].set(p["wa_r"].T)
    wa_blk = wa_blk.astype(jnp.bfloat16)

    def pad_row(v_l, v_r):  # (H,), (H,) -> (1, SW)
        return jnp.concatenate(
            [v_l.reshape(1, -1), v_r.reshape(1, -1),
             jnp.zeros((1, SW - H2), jnp.float32)], axis=1)

    ba_blk = pad_row(p["ba_l"], p["ba_r"])
    ctx_blk = pad_row(p["ctx_l"].reshape(-1), p["ctx_r"].reshape(-1))

    return dict(
        wih=wih_blk, whh=whh_blk, b=b_blk,
        wa=wa_blk, ba=ba_blk, ctx=ctx_blk,
        wlin=p["wlin"].T, blin=p["blin"].reshape(1, -1),
    )


if __name__ == "__main__":
    # fuse=True path requires batch_size == 1 per pair; independent sentence
    # pairs are batched along the kernel's parallel grid axis (P) instead.
    S, B, I, H, C = 8, 1, 32, 32, 3
    P = 2
    key = jax.random.PRNGKey(0)
    k_xl, k_xr, k_p = jax.random.split(key, 3)

    x_l = jax.random.normal(k_xl, (P, S, B, I), jnp.float32)
    x_r = jax.random.normal(k_xr, (P, S, B, I), jnp.float32)
    # init_sent_hidden(): zeros
    h0_l = jnp.zeros((P, B, H), jnp.float32)
    c0_l = jnp.zeros((P, B, H), jnp.float32)
    h0_r = jnp.zeros((P, B, H), jnp.float32)
    c0_r = jnp.zeros((P, B, H), jnp.float32)

    params = make_params(k_p, I, H, C)
    fused = fuse_params(params)      # one-time 128-lane-aligned block-diag prep

    logp, hidden = sent_atten_rnn(x_l, x_r, h0_l, c0_l, h0_r, c0_r, fused,
                                  hidden_size=H)
    jax.block_until_ready(logp)
    jax.block_until_ready(hidden)
    assert logp.shape == (P, 1, C)
    assert hidden[0][0].shape == (P, B, H)
    assert bool(jnp.all(jnp.isfinite(logp)))
    assert bool(jnp.all(jnp.isfinite(hidden[0][0])))
    print("KERNEL_OK")
</pallas_src>

<mosaic_0001>
module attributes {stable_mosaic.version = 11 : i64} {
  func.func @_sent_atten_kernel(%arg0: i32, %arg1: memref<1x8x64xbf16, #tpu.memory_space<vmem>>, %arg2: memref<1x1x128xf32, #tpu.memory_space<vmem>>, %arg3: memref<1x1x128xf32, #tpu.memory_space<vmem>>, %arg4: memref<64x512xbf16, #tpu.memory_space<vmem>>, %arg5: memref<128x512xbf16, #tpu.memory_space<vmem>>, %arg6: memref<1x512xf32, #tpu.memory_space<vmem>>, %arg7: memref<128x128xbf16, #tpu.memory_space<vmem>>, %arg8: memref<1x128xf32, #tpu.memory_space<vmem>>, %arg9: memref<1x128xf32, #tpu.memory_space<vmem>>, %arg10: memref<7x3xf32, #tpu.memory_space<vmem>>, %arg11: memref<1x3xf32, #tpu.memory_space<vmem>>, %arg12: memref<1x1x3xf32, #tpu.memory_space<vmem>>, %arg13: memref<1x1x128xf32, #tpu.memory_space<vmem>>, %arg14: memref<1x1x128xf32, #tpu.memory_space<vmem>>, %arg15: memref<8x128xf32, #tpu.memory_space<vmem>>) attributes {dimension_semantics = [#tpu.dimension_semantics<parallel>], iteration_bounds = array<i64: 2>, scalar_prefetch = 0 : i64, scratch_operands = 1 : i64, tpu.core_type = #tpu.core_type<tc>, window_params = [{transform_indices = @transform_0, window_bounds = array<i64: 1, 8, 64>}, {transform_indices = @transform_1, window_bounds = array<i64: 1, 1, 128>}, {transform_indices = @transform_2, window_bounds = array<i64: 1, 1, 128>}, {pipeline_mode = #tpu.pipeline_mode<synchronous>, transform_indices = @transform_3, window_bounds = array<i64: 64, 512>}, {pipeline_mode = #tpu.pipeline_mode<synchronous>, transform_indices = @transform_4, window_bounds = array<i64: 128, 512>}, {pipeline_mode = #tpu.pipeline_mode<synchronous>, transform_indices = @transform_5, window_bounds = array<i64: 1, 512>}, {pipeline_mode = #tpu.pipeline_mode<synchronous>, transform_indices = @transform_6, window_bounds = array<i64: 128, 128>}, {pipeline_mode = #tpu.pipeline_mode<synchronous>, transform_indices = @transform_7, window_bounds = array<i64: 1, 128>}, {pipeline_mode = #tpu.pipeline_mode<synchronous>, transform_indices = @transform_8, window_bounds = array<i64: 1, 128>}, {pipeline_mode = #tpu.pipeline_mode<synchronous>, transform_indices = @transform_9, window_bounds = array<i64: 7, 3>}, {pipeline_mode = #tpu.pipeline_mode<synchronous>, transform_indices = @transform_10, window_bounds = array<i64: 1, 3>}, {transform_indices = @transform_11, window_bounds = array<i64: 1, 1, 3>}, {transform_indices = @transform_12, window_bounds = array<i64: 1, 1, 128>}, {transform_indices = @transform_13, window_bounds = array<i64: 1, 1, 128>}]} {
    %c0 = arith.constant 0 : index
    %c0_0 = arith.constant 0 : index
    %c0_1 = arith.constant 0 : index
    %0 = vector.load %arg1[%c0, %c0_0, %c0_1] : memref<1x8x64xbf16, #tpu.memory_space<vmem>>, vector<1x8x64xbf16>
    %1 = vector.shape_cast %0 : vector<1x8x64xbf16> to vector<8x64xbf16>
    %c0_2 = arith.constant 0 : index
    %c0_3 = arith.constant 0 : index
    %2 = vector.load %arg4[%c0_2, %c0_3] : memref<64x512xbf16, #tpu.memory_space<vmem>>, vector<64x512xbf16>
    %cst = arith.constant dense<0.000000e+00> : vector<8x512xf32>
    %3 = tpu.matmul %1, %2, %cst {dimension_numbers = #tpu.dot_dimension_numbers<[1], [0], [0], [1], [0, 0, 1, 1], [], []>} : vector<8x64xbf16>, vector<64x512xbf16>, vector<8x512xf32> -> vector<8x512xf32>
    %c0_4 = arith.constant 0 : index
    %c0_5 = arith.constant 0 : index
    %4 = vector.load %arg6[%c0_4, %c0_5] : memref<1x512xf32, #tpu.memory_space<vmem>>, vector<1x512xf32>
    %5 = vector.broadcast %4 : vector<1x512xf32> to vector<8x512xf32>
    %6 = arith.addf %3, %5 : vector<8x512xf32>
    %c0_6 = arith.constant 0 : index
    %c0_7 = arith.constant 0 : index
    %7 = vector.load %arg5[%c0_6, %c0_7] : memref<128x512xbf16, #tpu.memory_space<vmem>>, vector<128x512xbf16>
    %c0_8 = arith.constant 0 : index
    %c0_9 = arith.constant 0 : index
    %c0_10 = arith.constant 0 : index
    %8 = vector.load %arg2[%c0_8, %c0_9, %c0_10] : memref<1x1x128xf32, #tpu.memory_space<vmem>>, vector<1x1x128xf32>
    %9 = vector.shape_cast %8 : vector<1x1x128xf32> to vector<1x128xf32>
    %c0_11 = arith.constant 0 : index
    %c0_12 = arith.constant 0 : index
    %c0_13 = arith.constant 0 : index
    %10 = vector.load %arg3[%c0_11, %c0_12, %c0_13] : memref<1x1x128xf32, #tpu.memory_space<vmem>>, vector<1x1x128xf32>
    %11 = vector.shape_cast %10 : vector<1x1x128xf32> to vector<1x128xf32>
    %12 = vector.extract_strided_slice %6 {offsets = [0, 0], sizes = [1, 512], strides = [1, 1]} : vector<8x512xf32> to vector<1x512xf32>
    %13 = arith.truncf %9 : vector<1x128xf32> to vector<1x128xbf16>
    %cst_14 = arith.constant dense<0.000000e+00> : vector<1x512xf32>
    %14 = tpu.matmul %13, %7, %cst_14 {dimension_numbers = #tpu.dot_dimension_numbers<[1], [0], [0], [1], [0, 0, 1, 1], [], []>} : vector<1x128xbf16>, vector<128x512xbf16>, vector<1x512xf32> -> vector<1x512xf32>
    %15 = arith.addf %12, %14 : vector<1x512xf32>
    %16 = arith.negf %15 : vector<1x512xf32>
    %17 = math.exp %16 : vector<1x512xf32>
    %cst_15 = arith.constant 1.000000e+00 : f32
    %18 = vector.broadcast %cst_15 : f32 to vector<1x512xf32>
    %19 = arith.addf %18, %17 : vector<1x512xf32>
    %20 = arith.divf %18, %19 : vector<1x512xf32>
    %21 = vector.extract_strided_slice %20 {offsets = [0, 0], sizes = [1, 128], strides = [1, 1]} : vector<1x512xf32> to vector<1x128xf32>
    %22 = vector.extract_strided_slice %20 {offsets = [0, 128], sizes = [1, 128], strides = [1, 1]} : vector<1x512xf32> to vector<1x128xf32>
    %23 = vector.extract_strided_slice %20 {offsets = [0, 256], sizes = [1, 128], strides = [1, 1]} : vector<1x512xf32> to vector<1x128xf32>
    %24 = vector.extract_strided_slice %20 {offsets = [0, 384], sizes = [1, 128], strides = [1, 1]} : vector<1x512xf32> to vector<1x128xf32>
    %cst_16 = arith.constant 2.000000e+00 : f32
    %25 = vector.broadcast %cst_16 : f32 to vector<1x128xf32>
    %26 = arith.mulf %25, %24 : vector<1x128xf32>
    %cst_17 = arith.constant 1.000000e+00 : f32
    %27 = vector.broadcast %cst_17 : f32 to vector<1x128xf32>
    %28 = arith.subf %26, %27 : vector<1x128xf32>
    %29 = arith.mulf %22, %11 : vector<1x128xf32>
    %30 = arith.mulf %21, %28 : vector<1x128xf32>
    %31 = arith.addf %29, %30 : vector<1x128xf32>
    %32 = math.tanh %31 : vector<1x128xf32>
    %33 = arith.mulf %23, %32 : vector<1x128xf32>
    %c0_18 = arith.constant 0 : index
    %c0_19 = arith.constant 0 : index
    %34 = vector.load %arg15[%c0_18, %c0_19] : memref<8x128xf32, #tpu.memory_space<vmem>>, vector<1x128xf32>
    tpu.vector_store %arg15[%c0_18, %c0_19], %33 {strides = array<i32>} : memref<8x128xf32, #tpu.memory_space<vmem>>, vector<1x128xf32>,
    %35 = vector.extract_strided_slice %6 {offsets = [1, 0], sizes = [1, 512], strides = [1, 1]} : vector<8x512xf32> to vector<1x512xf32>
    %36 = arith.truncf %33 : vector<1x128xf32> to vector<1x128xbf16>
    %cst_20 = arith.constant dense<0.000000e+00> : vector<1x512xf32>
    %37 = tpu.matmul %36, %7, %cst_20 {dimension_numbers = #tpu.dot_dimension_numbers<[1], [0], [0], [1], [0, 0, 1, 1], [], []>} : vector<1x128xbf16>, vector<128x512xbf16>, vector<1x512xf32> -> vector<1x512xf32>
    %38 = arith.addf %35, %37 : vector<1x512xf32>
    %39 = arith.negf %38 : vector<1x512xf32>
    %40 = math.exp %39 : vector<1x512xf32>
    %cst_21 = arith.constant 1.000000e+00 : f32
    %41 = vector.broadcast %cst_21 : f32 to vector<1x512xf32>
    %42 = arith.addf %41, %40 : vector<1x512xf32>
    %43 = arith.divf %41, %42 : vector<1x512xf32>
    %44 = vector.extract_strided_slice %43 {offsets = [0, 0], sizes = [1, 128], strides = [1, 1]} : vector<1x512xf32> to vector<1x128xf32>
    %45 = vector.extract_strided_slice %43 {offsets = [0, 128], sizes = [1, 128], strides = [1, 1]} : vector<1x512xf32> to vector<1x128xf32>
    %46 = vector.extract_strided_slice %43 {offsets = [0, 256], sizes = [1, 128], strides = [1, 1]} : vector<1x512xf32> to vector<1x128xf32>
    %47 = vector.extract_strided_slice %43 {offsets = [0, 384], sizes = [1, 128], strides = [1, 1]} : vector<1x512xf32> to vector<1x128xf32>
    %cst_22 = arith.constant 2.000000e+00 : f32
    %48 = vector.broadcast %cst_22 : f32 to vector<1x128xf32>
    %49 = arith.mulf %48, %47 : vector<1x128xf32>
    %cst_23 = arith.constant 1.000000e+00 : f32
    %50 = vector.broadcast %cst_23 : f32 to vector<1x128xf32>
    %51 = arith.subf %49, %50 : vector<1x128xf32>
    %52 = arith.mulf %45, %31 : vector<1x128xf32>
    %53 = arith.mulf %44, %51 : vector<1x128xf32>
    %54 = arith.addf %52, %53 : vector<1x128xf32>
    %55 = math.tanh %54 : vector<1x128xf32>
    %56 = arith.mulf %46, %55 : vector<1x128xf32>
    %c1 = arith.constant 1 : index
    %c0_24 = arith.constant 0 : index
    %57 = vector.load %arg15[%c1, %c0_24] : memref<8x128xf32, #tpu.memory_space<vmem>>, vector<1x128xf32>
    tpu.vector_store %arg15[%c1, %c0_24], %56 {strides = array<i32>} : memref<8x128xf32, #tpu.memory_space<vmem>>, vector<1x128xf32>,
    %58 = vector.extract_strided_slice %6 {offsets = [2, 0], sizes = [1, 512], strides = [1, 1]} : vector<8x512xf32> to vector<1x512xf32>
    %59 = arith.truncf %56 : vector<1x128xf32> to vector<1x128xbf16>
    %cst_25 = arith.constant dense<0.000000e+00> : vector<1x512xf32>
    %60 = tpu.matmul %59, %7, %cst_25 {dimension_numbers = #tpu.dot_dimension_numbers<[1], [0], [0], [1], [0, 0, 1, 1], [], []>} : vector<1x128xbf16>, vector<128x512xbf16>, vector<1x512xf32> -> vector<1x512xf32>
    %61 = arith.addf %58, %60 : vector<1x512xf32>
    %62 = arith.negf %61 : vector<1x512xf32>
    %63 = math.exp %62 : vector<1x512xf32>
    %cst_26 = arith.constant 1.000000e+00 : f32
    %64 = vector.broadcast %cst_26 : f32 to vector<1x512xf32>
    %65 = arith.addf %64, %63 : vector<1x512xf32>
    %66 = arith.divf %64, %65 : vector<1x512xf32>
    %67 = vector.extract_strided_slice %66 {offsets = [0, 0], sizes = [1, 128], strides = [1, 1]} : vector<1x512xf32> to vector<1x128xf32>
    %68 = vector.extract_strided_slice %66 {offsets = [0, 128], sizes = [1, 128], strides = [1, 1]} : vector<1x512xf32> to vector<1x128xf32>
    %69 = vector.extract_strided_slice %66 {offsets = [0, 256], sizes = [1, 128], strides = [1, 1]} : vector<1x512xf32> to vector<1x128xf32>
    %70 = vector.extract_strided_slice %66 {offsets = [0, 384], sizes = [1, 128], strides = [1, 1]} : vector<1x512xf32> to vector<1x128xf32>
    %cst_27 = arith.constant 2.000000e+00 : f32
    %71 = vector.broadcast %cst_27 : f32 to vector<1x128xf32>
    %72 = arith.mulf %71, %70 : vector<1x128xf32>
    %cst_28 = arith.constant 1.000000e+00 : f32
    %73 = vector.broadcast %cst_28 : f32 to vector<1x128xf32>
    %74 = arith.subf %72, %73 : vector<1x128xf32>
    %75 = arith.mulf %68, %54 : vector<1x128xf32>
    %76 = arith.mulf %67, %74 : vector<1x128xf32>
    %77 = arith.addf %75, %76 : vector<1x128xf32>
    %78 = math.tanh %77 : vector<1x128xf32>
    %79 = arith.mulf %69, %78 : vector<1x128xf32>
    %c2 = arith.constant 2 : index
    %c0_29 = arith.constant 0 : index
    %80 = vector.load %arg15[%c2, %c0_29] : memref<8x128xf32, #tpu.memory_space<vmem>>, vector<1x128xf32>
    tpu.vector_store %arg15[%c2, %c0_29], %79 {strides = array<i32>} : memref<8x128xf32, #tpu.memory_space<vmem>>, vector<1x128xf32>,
    %81 = vector.extract_strided_slice %6 {offsets = [3, 0], sizes = [1, 512], strides = [1, 1]} : vector<8x512xf32> to vector<1x512xf32>
    %82 = arith.truncf %79 : vector<1x128xf32> to vector<1x128xbf16>
    %cst_30 = arith.constant dense<0.000000e+00> : vector<1x512xf32>
    %83 = tpu.matmul %82, %7, %cst_30 {dimension_numbers = #tpu.dot_dimension_numbers<[1], [0], [0], [1], [0, 0, 1, 1], [], []>} : vector<1x128xbf16>, vector<128x512xbf16>, vector<1x512xf32> -> vector<1x512xf32>
    %84 = arith.addf %81, %83 : vector<1x512xf32>
    %85 = arith.negf %84 : vector<1x512xf32>
    %86 = math.exp %85 : vector<1x512xf32>
    %cst_31 = arith.constant 1.000000e+00 : f32
    %87 = vector.broadcast %cst_31 : f32 to vector<1x512xf32>
    %88 = arith.addf %87, %86 : vector<1x512xf32>
    %89 = arith.divf %87, %88 : vector<1x512xf32>
    %90 = vector.extract_strided_slice %89 {offsets = [0, 0], sizes = [1, 128], strides = [1, 1]} : vector<1x512xf32> to vector<1x128xf32>
    %91 = vector.extract_strided_slice %89 {offsets = [0, 128], sizes = [1, 128], strides = [1, 1]} : vector<1x512xf32> to vector<1x128xf32>
    %92 = vector.extract_strided_slice %89 {offsets = [0, 256], sizes = [1, 128], strides = [1, 1]} : vector<1x512xf32> to vector<1x128xf32>
    %93 = vector.extract_strided_slice %89 {offsets = [0, 384], sizes = [1, 128], strides = [1, 1]} : vector<1x512xf32> to vector<1x128xf32>
    %cst_32 = arith.constant 2.000000e+00 : f32
    %94 = vector.broadcast %cst_32 : f32 to vector<1x128xf32>
    %95 = arith.mulf %94, %93 : vector<1x128xf32>
    %cst_33 = arith.constant 1.000000e+00 : f32
    %96 = vector.broadcast %cst_33 : f32 to vector<1x128xf32>
    %97 = arith.subf %95, %96 : vector<1x128xf32>
    %98 = arith.mulf %91, %77 : vector<1x128xf32>
    %99 = arith.mulf %90, %97 : vector<1x128xf32>
    %100 = arith.addf %98, %99 : vector<1x128xf32>
    %101 = math.tanh %100 : vector<1x128xf32>
    %102 = arith.mulf %92, %101 : vector<1x128xf32>
    %c3 = arith.constant 3 : index
    %c0_34 = arith.constant 0 : index
    %103 = vector.load %arg15[%c3, %c0_34] : memref<8x128xf32, #tpu.memory_space<vmem>>, vector<1x128xf32>
    tpu.vector_store %arg15[%c3, %c0_34], %102 {strides = array<i32>} : memref<8x128xf32, #tpu.memory_space<vmem>>, vector<1x128xf32>,
    %104 = vector.extract_strided_slice %6 {offsets = [4, 0], sizes = [1, 512], strides = [1, 1]} : vector<8x512xf32> to vector<1x512xf32>
    %105 = arith.truncf %102 : vector<1x128xf32> to vector<1x128xbf16>
    %cst_35 = arith.constant dense<0.000000e+00> : vector<1x512xf32>
    %106 = tpu.matmul %105, %7, %cst_35 {dimension_numbers = #tpu.dot_dimension_numbers<[1], [0], [0], [1], [0, 0, 1, 1], [], []>} : vector<1x128xbf16>, vector<128x512xbf16>, vector<1x512xf32> -> vector<1x512xf32>
    %107 = arith.addf %104, %106 : vector<1x512xf32>
    %108 = arith.negf %107 : vector<1x512xf32>
    %109 = math.exp %108 : vector<1x512xf32>
    %cst_36 = arith.constant 1.000000e+00 : f32
    %110 = vector.broadcast %cst_36 : f32 to vector<1x512xf32>
    %111 = arith.addf %110, %109 : vector<1x512xf32>
    %112 = arith.divf %110, %111 : vector<1x512xf32>
    %113 = vector.extract_strided_slice %112 {offsets = [0, 0], sizes = [1, 128], strides = [1, 1]} : vector<1x512xf32> to vector<1x128xf32>
    %114 = vector.extract_strided_slice %112 {offsets = [0, 128], sizes = [1, 128], strides = [1, 1]} : vector<1x512xf32> to vector<1x128xf32>
    %115 = vector.extract_strided_slice %112 {offsets = [0, 256], sizes = [1, 128], strides = [1, 1]} : vector<1x512xf32> to vector<1x128xf32>
    %116 = vector.extract_strided_slice %112 {offsets = [0, 384], sizes = [1, 128], strides = [1, 1]} : vector<1x512xf32> to vector<1x128xf32>
    %cst_37 = arith.constant 2.000000e+00 : f32
    %117 = vector.broadcast %cst_37 : f32 to vector<1x128xf32>
    %118 = arith.mulf %117, %116 : vector<1x128xf32>
    %cst_38 = arith.constant 1.000000e+00 : f32
    %119 = vector.broadcast %cst_38 : f32 to vector<1x128xf32>
    %120 = arith.subf %118, %119 : vector<1x128xf32>
    %121 = arith.mulf %114, %100 : vector<1x128xf32>
    %122 = arith.mulf %113, %120 : vector<1x128xf32>
    %123 = arith.addf %121, %122 : vector<1x128xf32>
    %124 = math.tanh %123 : vector<1x128xf32>
    %125 = arith.mulf %115, %124 : vector<1x128xf32>
    %c4 = arith.constant 4 : index
    %c0_39 = arith.constant 0 : index
    %126 = vector.load %arg15[%c4, %c0_39] : memref<8x128xf32, #tpu.memory_space<vmem>>, vector<1x128xf32>
    tpu.vector_store %arg15[%c4, %c0_39], %125 {strides = array<i32>} : memref<8x128xf32, #tpu.memory_space<vmem>>, vector<1x128xf32>,
    %127 = vector.extract_strided_slice %6 {offsets = [5, 0], sizes = [1, 512], strides = [1, 1]} : vector<8x512xf32> to vector<1x512xf32>
    %128 = arith.truncf %125 : vector<1x128xf32> to vector<1x128xbf16>
    %cst_40 = arith.constant dense<0.000000e+00> : vector<1x512xf32>
    %129 = tpu.matmul %128, %7, %cst_40 {dimension_numbers = #tpu.dot_dimension_numbers<[1], [0], [0], [1], [0, 0, 1, 1], [], []>} : vector<1x128xbf16>, vector<128x512xbf16>, vector<1x512xf32> -> vector<1x512xf32>
    %130 = arith.addf %127, %129 : vector<1x512xf32>
    %131 = arith.negf %130 : vector<1x512xf32>
    %132 = math.exp %131 : vector<1x512xf32>
    %cst_41 = arith.constant 1.000000e+00 : f32
    %133 = vector.broadcast %cst_41 : f32 to vector<1x512xf32>
    %134 = arith.addf %133, %132 : vector<1x512xf32>
    %135 = arith.divf %133, %134 : vector<1x512xf32>
    %136 = vector.extract_strided_slice %135 {offsets = [0, 0], sizes = [1, 128], strides = [1, 1]} : vector<1x512xf32> to vector<1x128xf32>
    %137 = vector.extract_strided_slice %135 {offsets = [0, 128], sizes = [1, 128], strides = [1, 1]} : vector<1x512xf32> to vector<1x128xf32>
    %138 = vector.extract_strided_slice %135 {offsets = [0, 256], sizes = [1, 128], strides = [1, 1]} : vector<1x512xf32> to vector<1x128xf32>
    %139 = vector.extract_strided_slice %135 {offsets = [0, 384], sizes = [1, 128], strides = [1, 1]} : vector<1x512xf32> to vector<1x128xf32>
    %cst_42 = arith.constant 2.000000e+00 : f32
    %140 = vector.broadcast %cst_42 : f32 to vector<1x128xf32>
    %141 = arith.mulf %140, %139 : vector<1x128xf32>
    %cst_43 = arith.constant 1.000000e+00 : f32
    %142 = vector.broadcast %cst_43 : f32 to vector<1x128xf32>
    %143 = arith.subf %141, %142 : vector<1x128xf32>
    %144 = arith.mulf %137, %123 : vector<1x128xf32>
    %145 = arith.mulf %136, %143 : vector<1x128xf32>
    %146 = arith.addf %144, %145 : vector<1x128xf32>
    %147 = math.tanh %146 : vector<1x128xf32>
    %148 = arith.mulf %138, %147 : vector<1x128xf32>
    %c5 = arith.constant 5 : index
    %c0_44 = arith.constant 0 : index
    %149 = vector.load %arg15[%c5, %c0_44] : memref<8x128xf32, #tpu.memory_space<vmem>>, vector<1x128xf32>
    tpu.vector_store %arg15[%c5, %c0_44], %148 {strides = array<i32>} : memref<8x128xf32, #tpu.memory_space<vmem>>, vector<1x128xf32>,
    %150 = vector.extract_strided_slice %6 {offsets = [6, 0], sizes = [1, 512], strides = [1, 1]} : vector<8x512xf32> to vector<1x512xf32>
    %151 = arith.truncf %148 : vector<1x128xf32> to vector<1x128xbf16>
    %cst_45 = arith.constant dense<0.000000e+00> : vector<1x512xf32>
    %152 = tpu.matmul %151, %7, %cst_45 {dimension_numbers = #tpu.dot_dimension_numbers<[1], [0], [0], [1], [0, 0, 1, 1], [], []>} : vector<1x128xbf16>, vector<128x512xbf16>, vector<1x512xf32> -> vector<1x512xf32>
    %153 = arith.addf %150, %152 : vector<1x512xf32>
    %154 = arith.negf %153 : vector<1x512xf32>
    %155 = math.exp %154 : vector<1x512xf32>
    %cst_46 = arith.constant 1.000000e+00 : f32
    %156 = vector.broadcast %cst_46 : f32 to vector<1x512xf32>
    %157 = arith.addf %156, %155 : vector<1x512xf32>
    %158 = arith.divf %156, %157 : vector<1x512xf32>
    %159 = vector.extract_strided_slice %158 {offsets = [0, 0], sizes = [1, 128], strides = [1, 1]} : vector<1x512xf32> to vector<1x128xf32>
    %160 = vector.extract_strided_slice %158 {offsets = [0, 128], sizes = [1, 128], strides = [1, 1]} : vector<1x512xf32> to vector<1x128xf32>
    %161 = vector.extract_strided_slice %158 {offsets = [0, 256], sizes = [1, 128], strides = [1, 1]} : vector<1x512xf32> to vector<1x128xf32>
    %162 = vector.extract_strided_slice %158 {offsets = [0, 384], sizes = [1, 128], strides = [1, 1]} : vector<1x512xf32> to vector<1x128xf32>
    %cst_47 = arith.constant 2.000000e+00 : f32
    %163 = vector.broadcast %cst_47 : f32 to vector<1x128xf32>
    %164 = arith.mulf %163, %162 : vector<1x128xf32>
    %cst_48 = arith.constant 1.000000e+00 : f32
    %165 = vector.broadcast %cst_48 : f32 to vector<1x128xf32>
    %166 = arith.subf %164, %165 : vector<1x128xf32>
    %167 = arith.mulf %160, %146 : vector<1x128xf32>
    %168 = arith.mulf %159, %166 : vector<1x128xf32>
    %169 = arith.addf %167, %168 : vector<1x128xf32>
    %170 = math.tanh %169 : vector<1x128xf32>
    %171 = arith.mulf %161, %170 : vector<1x128xf32>
    %c6 = arith.constant 6 : index
    %c0_49 = arith.constant 0 : index
    %172 = vector.load %arg15[%c6, %c0_49] : memref<8x128xf32, #tpu.memory_space<vmem>>, vector<1x128xf32>
    tpu.vector_store %arg15[%c6, %c0_49], %171 {strides = array<i32>} : memref<8x128xf32, #tpu.memory_space<vmem>>, vector<1x128xf32>,
    %173 = vector.extract_strided_slice %6 {offsets = [7, 0], sizes = [1, 512], strides = [1, 1]} : vector<8x512xf32> to vector<1x512xf32>
    %174 = arith.truncf %171 : vector<1x128xf32> to vector<1x128xbf16>
    %cst_50 = arith.constant dense<0.000000e+00> : vector<1x512xf32>
    %175 = tpu.matmul %174, %7, %cst_50 {dimension_numbers = #tpu.dot_dimension_numbers<[1], [0], [0], [1], [0, 0, 1, 1], [], []>} : vector<1x128xbf16>, vector<128x512xbf16>, vector<1x512xf32> -> vector<1x512xf32>
    %176 = arith.addf %173, %175 : vector<1x512xf32>
    %177 = arith.negf %176 : vector<1x512xf32>
    %178 = math.exp %177 : vector<1x512xf32>
    %cst_51 = arith.constant 1.000000e+00 : f32
    %179 = vector.broadcast %cst_51 : f32 to vector<1x512xf32>
    %180 = arith.addf %179, %178 : vector<1x512xf32>
    %181 = arith.divf %179, %180 : vector<1x512xf32>
    %182 = vector.extract_strided_slice %181 {offsets = [0, 0], sizes = [1, 128], strides = [1, 1]} : vector<1x512xf32> to vector<1x128xf32>
    %183 = vector.extract_strided_slice %181 {offsets = [0, 128], sizes = [1, 128], strides = [1, 1]} : vector<1x512xf32> to vector<1x128xf32>
    %184 = vector.extract_strided_slice %181 {offsets = [0, 256], sizes = [1, 128], strides = [1, 1]} : vector<1x512xf32> to vector<1x128xf32>
    %185 = vector.extract_strided_slice %181 {offsets = [0, 384], sizes = [1, 128], strides = [1, 1]} : vector<1x512xf32> to vector<1x128xf32>
    %cst_52 = arith.constant 2.000000e+00 : f32
    %186 = vector.broadcast %cst_52 : f32 to vector<1x128xf32>
    %187 = arith.mulf %186, %185 : vector<1x128xf32>
    %cst_53 = arith.constant 1.000000e+00 : f32
    %188 = vector.broadcast %cst_53 : f32 to vector<1x128xf32>
    %189 = arith.subf %187, %188 : vector<1x128xf32>
    %190 = arith.mulf %183, %169 : vector<1x128xf32>
    %191 = arith.mulf %182, %189 : vector<1x128xf32>
    %192 = arith.addf %190, %191 : vector<1x128xf32>
    %193 = math.tanh %192 : vector<1x128xf32>
    %194 = arith.mulf %184, %193 : vector<1x128xf32>
    %c7 = arith.constant 7 : index
    %c0_54 = arith.constant 0 : index
    %195 = vector.load %arg15[%c7, %c0_54] : memref<8x128xf32, #tpu.memory_space<vmem>>, vector<1x128xf32>
    tpu.vector_store %arg15[%c7, %c0_54], %194 {strides = array<i32>} : memref<8x128xf32, #tpu.memory_space<vmem>>, vector<1x128xf32>,
    %c0_55 = arith.constant 0 : index
    %c0_56 = arith.constant 0 : index
    %c0_57 = arith.constant 0 : index
    %196 = vector.load %arg13[%c0_55, %c0_56, %c0_57] : memref<1x1x128xf32, #tpu.memory_space<vmem>>, vector<1x1x128xf32>
    %197 = vector.shape_cast %196 : vector<1x1x128xf32> to vector<1x128xf32>
    %198 = vector.shape_cast %194 : vector<1x128xf32> to vector<1x1x128xf32>
    tpu.vector_store %arg13[%c0_55, %c0_56, %c0_57], %198 {strides = array<i32>} : memref<1x1x128xf32, #tpu.memory_space<vmem>>, vector<1x1x128xf32>,
    %c0_58 = arith.constant 0 : index
    %c0_59 = arith.constant 0 : index
    %c0_60 = arith.constant 0 : index
    %199 = vector.load %arg14[%c0_58, %c0_59, %c0_60] : memref<1x1x128xf32, #tpu.memory_space<vmem>>, vector<1x1x128xf32>
    %200 = vector.shape_cast %199 : vector<1x1x128xf32> to vector<1x128xf32>
    %201 = vector.shape_cast %192 : vector<1x128xf32> to vector<1x1x128xf32>
    tpu.vector_store %arg14[%c0_58, %c0_59, %c0_60], %201 {strides = array<i32>} : memref<1x1x128xf32, #tpu.memory_space<vmem>>, vector<1x1x128xf32>,
    %c0_61 = arith.constant 0 : index
    %c0_62 = arith.constant 0 : index
    %202 = vector.load %arg15[%c0_61, %c0_62] : memref<8x128xf32, #tpu.memory_space<vmem>>, vector<8x128xf32>
    %203 = arith.truncf %202 : vector<8x128xf32> to vector<8x128xbf16>
    %c0_63 = arith.constant 0 : index
    %c0_64 = arith.constant 0 : index
    %204 = vector.load %arg7[%c0_63, %c0_64] : memref<128x128xbf16, #tpu.memory_space<vmem>>, vector<128x128xbf16>
    %cst_65 = arith.constant dense<0.000000e+00> : vector<8x128xf32>
    %205 = tpu.matmul %203, %204, %cst_65 {dimension_numbers = #tpu.dot_dimension_numbers<[1], [0], [0], [1], [0, 0, 1, 1], [], []>} : vector<8x128xbf16>, vector<128x128xbf16>, vector<8x128xf32> -> vector<8x128xf32>
    %c0_66 = arith.constant 0 : index
    %c0_67 = arith.constant 0 : index
    %206 = vector.load %arg8[%c0_66, %c0_67] : memref<1x128xf32, #tpu.memory_space<vmem>>, vector<1x128xf32>
    %207 = vector.broadcast %206 : vector<1x128xf32> to vector<8x128xf32>
    %208 = arith.addf %205, %207 : vector<8x128xf32>
    %209 = math.tanh %208 : vector<8x128xf32>
    %c0_68 = arith.constant 0 : index
    %c0_69 = arith.constant 0 : index
    %210 = vector.load %arg9[%c0_68, %c0_69] : memref<1x128xf32, #tpu.memory_space<vmem>>, vector<1x128xf32>
    %211 = vector.broadcast %210 : vector<1x128xf32> to vector<8x128xf32>
    %212 = arith.mulf %209, %211 : vector<8x128xf32>
    %213 = tpu.iota {dimensions = array<i32: 1>} : vector<8x128xi32>
    %c32_i32 = arith.constant 32 : i32
    %214 = vector.broadcast %c32_i32 : i32 to vector<8x128xi32>
    %215 = arith.cmpi slt, %213, %214 : vector<8x128xi32>
    %cst_70 = arith.constant 0.000000e+00 : f32
    %216 = vector.broadcast %cst_70 : f32 to vector<8x128xf32>
    %217 = arith.select %215, %212, %216 : vector<8x128xi1>, vector<8x128xf32>
    %cst_71 = arith.constant dense<0.000000e+00> : vector<8xf32>
    %218 = vector.multi_reduction <add>, %217, %cst_71 [1] : vector<8x128xf32> to vector<8xf32>
    %219 = vector.shape_cast %218 : vector<8xf32> to vector<8x1xf32>
    %cst_72 = arith.constant 0.000000e+00 : f32
    %220 = vector.broadcast %cst_72 : f32 to vector<8x128xf32>
    %221 = arith.select %215, %220, %212 : vector<8x128xi1>, vector<8x128xf32>
    %cst_73 = arith.constant dense<0.000000e+00> : vector<8xf32>
    %222 = vector.multi_reduction <add>, %221, %cst_73 [1] : vector<8x128xf32> to vector<8xf32>
    %223 = vector.shape_cast %222 : vector<8xf32> to vector<8x1xf32>
    %cst_74 = arith.constant dense<0xFF800000> : vector<1xf32>
    %224 = vector.multi_reduction <maximumf>, %219, %cst_74 [0] : vector<8x1xf32> to vector<1xf32>
    %225 = vector.shape_cast %224 : vector<1xf32> to vector<1x1xf32>
    %226 = vector.broadcast %225 : vector<1x1xf32> to vector<8x1xf32>
    %227 = arith.subf %219, %226 : vector<8x1xf32>
    %228 = math.exp %227 : vector<8x1xf32>
    %cst_75 = arith.constant dense<0.000000e+00> : vector<1xf32>
    %229 = vector.multi_reduction <add>, %228, %cst_75 [0] : vector<8x1xf32> to vector<1xf32>
    %230 = vector.shape_cast %229 : vector<1xf32> to vector<1x1xf32>
    %231 = vector.broadcast %230 : vector<1x1xf32> to vector<8x1xf32>
    %232 = arith.divf %228, %231 : vector<8x1xf32>
    %cst_76 = arith.constant dense<0xFF800000> : vector<1xf32>
    %233 = vector.multi_reduction <maximumf>, %223, %cst_76 [0] : vector<8x1xf32> to vector<1xf32>
    %234 = vector.shape_cast %233 : vector<1xf32> to vector<1x1xf32>
    %235 = vector.broadcast %234 : vector<1x1xf32> to vector<8x1xf32>
    %236 = arith.subf %223, %235 : vector<8x1xf32>
    %237 = math.exp %236 : vector<8x1xf32>
    %cst_77 = arith.constant dense<0.000000e+00> : vector<1xf32>
    %238 = vector.multi_reduction <add>, %237, %cst_77 [0] : vector<8x1xf32> to vector<1xf32>
    %239 = vector.shape_cast %238 : vector<1xf32> to vector<1x1xf32>
    %240 = vector.broadcast %239 : vector<1x1xf32> to vector<8x1xf32>
    %241 = arith.divf %237, %240 : vector<8x1xf32>
    %242 = vector.shape_cast %232 : vector<8x1xf32> to vector<8x1xf32>
    %243 = vector.broadcast %242 : vector<8x1xf32> to vector<8x128xf32>
    %244 = vector.shape_cast %241 : vector<8x1xf32> to vector<8x1xf32>
    %245 = vector.broadcast %244 : vector<8x1xf32> to vector<8x128xf32>
    %246 = arith.select %215, %243, %245 : vector<8x128xi1>, vector<8x128xf32>
    %247 = arith.mulf %246, %202 : vector<8x128xf32>
    %cst_78 = arith.constant dense<0.000000e+00> : vector<128xf32>
    %248 = vector.multi_reduction <add>, %247, %cst_78 [0] : vector<8x128xf32> to vector<128xf32>
    %249 = vector.shape_cast %248 : vector<128xf32> to vector<1x128xf32>
    %250 = vector.extract_strided_slice %249 {offsets = [0, 0], sizes = [1, 32], strides = [1, 1]} : vector<1x128xf32> to vector<1x32xf32>
    %251 = vector.extract_strided_slice %249 {offsets = [0, 32], sizes = [1, 32], strides = [1, 1]} : vector<1x128xf32> to vector<1x32xf32>
    %252 = arith.subf %250, %251 : vector<1x32xf32>
    %253 = math.absf %252 : vector<1x32xf32>
    %254 = arith.mulf %250, %251 : vector<1x32xf32>
    %255 = arith.mulf %250, %250 : vector<1x32xf32>
    %256 = arith.mulf %251, %251 : vector<1x32xf32>
    %257 = arith.mulf %252, %252 : vector<1x32xf32>
    %258 = arith.mulf %252, %252 : vector<1x32xf32>
    %259 = math.absf %250 : vector<1x32xf32>
    %260 = math.absf %251 : vector<1x32xf32>
    %261 = arith.addf %259, %260 : vector<1x32xf32>
    %cst_79 = arith.constant 9.99999993E-9 : f32
    %262 = vector.broadcast %cst_79 : f32 to vector<1x32xf32>
    %263 = arith.addf %261, %262 : vector<1x32xf32>
    %264 = arith.divf %258, %263 : vector<1x32xf32>
    %265 = tpu.concatenate %254, %255, %256, %257, %253, %264 in 0 : vector<1x32xf32>, vector<1x32xf32>, vector<1x32xf32>, vector<1x32xf32>, vector<1x32xf32>, vector<1x32xf32> -> vector<6x32xf32>
    %cst_80 = arith.constant dense<0.000000e+00> : vector<6xf32>
    %266 = vector.multi_reduction <add>, %265, %cst_80 [1] : vector<6x32xf32> to vector<6xf32>
    %267 = vector.shape_cast %266 : vector<6xf32> to vector<6x1xf32>
    %268 = vector.extract_strided_slice %267 {offsets = [0, 0], sizes = [1, 1], strides = [1, 1]} : vector<6x1xf32> to vector<1x1xf32>
    %269 = vector.extract_strided_slice %267 {offsets = [1, 0], sizes = [1, 1], strides = [1, 1]} : vector<6x1xf32> to vector<1x1xf32>
    %270 = vector.extract_strided_slice %267 {offsets = [2, 0], sizes = [1, 1], strides = [1, 1]} : vector<6x1xf32> to vector<1x1xf32>
    %271 = vector.extract_strided_slice %267 {offsets = [3, 0], sizes = [1, 1], strides = [1, 1]} : vector<6x1xf32> to vector<1x1xf32>
    %272 = vector.extract_strided_slice %267 {offsets = [4, 0], sizes = [1, 1], strides = [1, 1]} : vector<6x1xf32> to vector<1x1xf32>
    %273 = vector.extract_strided_slice %267 {offsets = [5, 0], sizes = [1, 1], strides = [1, 1]} : vector<6x1xf32> to vector<1x1xf32>
    %274 = arith.mulf %269, %270 : vector<1x1xf32>
    %275 = math.sqrt %274 : vector<1x1xf32>
    %cst_81 = arith.constant 9.99999993E-9 : f32
    %276 = vector.broadcast %cst_81 : f32 to vector<1x1xf32>
    %277 = arith.maximumf %275, %276 : vector<1x1xf32>
    %278 = arith.divf %268, %277 : vector<1x1xf32>
    %cst_82 = arith.constant 9.99999993E-9 : f32
    %279 = vector.broadcast %cst_82 : f32 to vector<1x1xf32>
    %280 = arith.addf %271, %279 : vector<1x1xf32>
    %281 = math.sqrt %280 : vector<1x1xf32>
    %cst_83 = arith.constant 3.125000e-02 : f32
    %282 = vector.broadcast %cst_83 : f32 to vector<1x1xf32>
    %283 = arith.mulf %272, %282 : vector<1x1xf32>
    %cst_84 = arith.constant 3.125000e-02 : f32
    %284 = vector.broadcast %cst_84 : f32 to vector<1x1xf32>
    %285 = arith.mulf %268, %284 : vector<1x1xf32>
    %cst_85 = arith.constant 1.000000e+00 : f32
    %286 = vector.broadcast %cst_85 : f32 to vector<1x1xf32>
    %287 = arith.addf %285, %286 : vector<1x1xf32>
    %288 = math.tanh %287 : vector<1x1xf32>
    %cst_86 = arith.constant 0.000000e+00 : f32
    %289 = vector.broadcast %cst_86 : f32 to vector<1x1xf32>
    %290 = arith.subf %289, %273 : vector<1x1xf32>
    %291 = math.exp %290 : vector<1x1xf32>
    %cst_87 = arith.constant 0.000000e+00 : f32
    %292 = vector.broadcast %cst_87 : f32 to vector<1x1xf32>
    %293 = arith.subf %292, %271 : vector<1x1xf32>
    %cst_88 = arith.constant 3.125000e-02 : f32
    %294 = vector.broadcast %cst_88 : f32 to vector<1x1xf32>
    %295 = arith.mulf %293, %294 : vector<1x1xf32>
    %296 = math.exp %295 : vector<1x1xf32>
    %297 = tpu.concatenate %278, %281, %268, %283, %288, %291, %296 in 1 : vector<1x1xf32>, vector<1x1xf32>, vector<1x1xf32>, vector<1x1xf32>, vector<1x1xf32>, vector<1x1xf32>, vector<1x1xf32> -> vector<1x7xf32>
    %c0_89 = arith.constant 0 : index
    %c0_90 = arith.constant 0 : index
    %298 = vector.load %arg10[%c0_89, %c0_90] : memref<7x3xf32, #tpu.memory_space<vmem>>, vector<7x3xf32>
    %cst_91 = arith.constant dense<0.000000e+00> : vector<1x3xf32>
    %299 = tpu.matmul %297, %298, %cst_91 {dimension_numbers = #tpu.dot_dimension_numbers<[1], [0], [0], [1], [0, 0, 1, 1], [], []>} : vector<1x7xf32>, vector<7x3xf32>, vector<1x3xf32> -> vector<1x3xf32>
    %c0_92 = arith.constant 0 : index
    %c0_93 = arith.constant 0 : index
    %300 = vector.load %arg11[%c0_92, %c0_93] : memref<1x3xf32, #tpu.memory_space<vmem>>, vector<1x3xf32>
    %301 = arith.addf %299, %300 : vector<1x3xf32>
    %cst_94 = arith.constant dense<0xFF800000> : vector<1xf32>
    %302 = vector.multi_reduction <maximumf>, %301, %cst_94 [1] : vector<1x3xf32> to vector<1xf32>
    %cst_95 = arith.constant 0xFF800000 : f32
    %303 = vector.broadcast %cst_95 : f32 to vector<1xf32>
    %304 = arith.maximumf %303, %302 : vector<1xf32>
    %305 = vector.shape_cast %304 : vector<1xf32> to vector<1x1xf32>
    %306 = vector.broadcast %305 : vector<1x1xf32> to vector<1x3xf32>
    %307 = arith.subf %301, %306 : vector<1x3xf32>
    %308 = math.exp %307 : vector<1x3xf32>
    %cst_96 = arith.constant dense<0.000000e+00> : vector<1xf32>
    %309 = vector.multi_reduction <add>, %308, %cst_96 [1] : vector<1x3xf32> to vector<1xf32>
    %310 = vector.shape_cast %309 : vector<1xf32> to vector<1x1xf32>
    %311 = math.log %310 : vector<1x1xf32>
    %312 = vector.broadcast %311 : vector<1x1xf32> to vector<1x3xf32>
    %313 = arith.subf %307, %312 : vector<1x3xf32>
    %c0_97 = arith.constant 0 : index
    %c0_98 = arith.constant 0 : index
    %c0_99 = arith.constant 0 : index
    %314 = vector.load %arg12[%c0_97, %c0_98, %c0_99] : memref<1x1x3xf32, #tpu.memory_space<vmem>>, vector<1x1x3xf32>
    %315 = vector.shape_cast %314 : vector<1x1x3xf32> to vector<1x3xf32>
    %316 = vector.shape_cast %313 : vector<1x3xf32> to vector<1x1x3xf32>
    tpu.vector_store %arg12[%c0_97, %c0_98, %c0_99], %316 {strides = array<i32>} : memref<1x1x3xf32, #tpu.memory_space<vmem>>, vector<1x1x3xf32>,
    return
  }
  func.func @transform_0(%arg0: i32) -> (i32, i32, i32) {
    %c0_i32 = arith.constant 0 : i32
    %c0_i32_0 = arith.constant 0 : i32
    %c0_i32_1 = arith.constant 0 : i32
    return %arg0, %c0_i32, %c0_i32_0 : i32, i32, i32
  }
  func.func @transform_1(%arg0: i32) -> (i32, i32, i32) {
    %c0_i32 = arith.constant 0 : i32
    %c0_i32_0 = arith.constant 0 : i32
    %c0_i32_1 = arith.constant 0 : i32
    return %arg0, %c0_i32, %c0_i32_0 : i32, i32, i32
  }
  func.func @transform_2(%arg0: i32) -> (i32, i32, i32) {
    %c0_i32 = arith.constant 0 : i32
    %c0_i32_0 = arith.constant 0 : i32
    %c0_i32_1 = arith.constant 0 : i32
    return %arg0, %c0_i32, %c0_i32_0 : i32, i32, i32
  }
  func.func @transform_3(%arg0: i32) -> (i32, i32) {
    %c0_i32 = arith.constant 0 : i32
    %c0_i32_0 = arith.constant 0 : i32
    %c0_i32_1 = arith.constant 0 : i32
    return %c0_i32, %c0_i32_0 : i32, i32
  }
  func.func @transform_4(%arg0: i32) -> (i32, i32) {
    %c0_i32 = arith.constant 0 : i32
    %c0_i32_0 = arith.constant 0 : i32
    %c0_i32_1 = arith.constant 0 : i32
    return %c0_i32, %c0_i32_0 : i32, i32
  }
  func.func @transform_5(%arg0: i32) -> (i32, i32) {
    %c0_i32 = arith.constant 0 : i32
    %c0_i32_0 = arith.constant 0 : i32
    %c0_i32_1 = arith.constant 0 : i32
    return %c0_i32, %c0_i32_0 : i32, i32
  }
  func.func @transform_6(%arg0: i32) -> (i32, i32) {
    %c0_i32 = arith.constant 0 : i32
    %c0_i32_0 = arith.constant 0 : i32
    %c0_i32_1 = arith.constant 0 : i32
    return %c0_i32, %c0_i32_0 : i32, i32
  }
  func.func @transform_7(%arg0: i32) -> (i32, i32) {
    %c0_i32 = arith.constant 0 : i32
    %c0_i32_0 = arith.constant 0 : i32
    %c0_i32_1 = arith.constant 0 : i32
    return %c0_i32, %c0_i32_0 : i32, i32
  }
  func.func @transform_8(%arg0: i32) -> (i32, i32) {
    %c0_i32 = arith.constant 0 : i32
    %c0_i32_0 = arith.constant 0 : i32
    %c0_i32_1 = arith.constant 0 : i32
    return %c0_i32, %c0_i32_0 : i32, i32
  }
  func.func @transform_9(%arg0: i32) -> (i32, i32) {
    %c0_i32 = arith.constant 0 : i32
    %c0_i32_0 = arith.constant 0 : i32
    %c0_i32_1 = arith.constant 0 : i32
    return %c0_i32, %c0_i32_0 : i32, i32
  }
  func.func @transform_10(%arg0: i32) -> (i32, i32) {
    %c0_i32 = arith.constant 0 : i32
    %c0_i32_0 = arith.constant 0 : i32
    %c0_i32_1 = arith.constant 0 : i32
    return %c0_i32, %c0_i32_0 : i32, i32
  }
  func.func @transform_11(%arg0: i32) -> (i32, i32, i32) {
    %c0_i32 = arith.constant 0 : i32
    %c0_i32_0 = arith.constant 0 : i32
    %c0_i32_1 = arith.constant 0 : i32
    return %arg0, %c0_i32, %c0_i32_0 : i32, i32, i32
  }
  func.func @transform_12(%arg0: i32) -> (i32, i32, i32) {
    %c0_i32 = arith.constant 0 : i32
    %c0_i32_0 = arith.constant 0 : i32
    %c0_i32_1 = arith.constant 0 : i32
    return %arg0, %c0_i32, %c0_i32_0 : i32, i32, i32
  }
  func.func @transform_13(%arg0: i32) -> (i32, i32, i32) {
    %c0_i32 = arith.constant 0 : i32
    %c0_i32_0 = arith.constant 0 : i32
    %c0_i32_1 = arith.constant 0 : i32
    return %arg0, %c0_i32, %c0_i32_0 : i32, i32, i32
  }
}

</mosaic_0001>

<bundles_post_ra>
// kernel: sent_atten_rnn.1
= control target key start
LH: loop header
LB: loop body
LE: loop exit
PB: predicated region body
PF: predicated region fallthrough
CT: control target
= control target key end

     0   :  { %s3848_s0 = inlined_call_operand.vmem [shape: bf16[2,8,64], index: 0, kind: input, shape index: {}]   ;;  %s3849_s1 = inlined_call_operand.vmem [shape: f32[2,1,128], index: 1, kind: input, shape index: {}]   ;;  %s3850_s2 = inlined_call_operand.vmem [shape: f32[2,1,128], index: 2, kind: input, shape index: {}]   ;;  %s3851_s3 = inlined_call_operand.hbm [shape: bf16[64,512], index: 3, kind: input, shape index: {}]   ;;  %s3852_s4 = inlined_call_operand.hbm [shape: bf16[128,512], index: 4, kind: input, shape index: {}]   ;;  %s3853_s5 = inlined_call_operand.vmem [shape: f32[1,512], index: 5, kind: input, shape index: {}]   ;;  %s3854_s6 = inlined_call_operand.vmem [shape: bf16[128,128], index: 6, kind: input, shape index: {}]   ;;  %s3855_s7 = inlined_call_operand.vmem [shape: f32[1,128], index: 7, kind: input, shape index: {}]   ;;  %s3856_s8 = inlined_call_operand.vmem [shape: f32[1,128], index: 8, kind: input, shape index: {}]   ;;  %s3857_s9 = inlined_call_operand.vmem [shape: f32[7,3], index: 9, kind: input, shape index: {}]   ;;  %s3858_s10 = inlined_call_operand.vmem [shape: f32[1,3], index: 10, kind: input, shape index: {}]   ;;  %s3859_s11 = inlined_call_operand.hbm [shape: f32[2,1,3], index: 11, kind: output, shape index: {0}]   ;;  %s3860_s12 = inlined_call_operand.vmem [shape: f32[2,1,128], index: 12, kind: output, shape index: {1}]   ;;  %s3861_s13 = inlined_call_operand.vmem [shape: f32[2,1,128], index: 13, kind: output, shape index: {2}]  }
   0x1   :  { %3866 = sst [smem:[#allocation15_spill]] %s3848_s0 }
   0x2   :  { %19 = vsyncpa [#allocation4], 0 }
   0x3   :  { %20 = vsyncpa [#allocation7], 0 }
   0x4   :  { %21 = vsyncpa [#allocation5], 0 }
   0x5   :  { %23 = vsyncpa [#allocation5 + $0x1], 0  ;;  %s3221_s25 = smov 0   ;;  %s3223_s26 = smov 0  }
   0x6   :  { %s3225_s27 = smov 0   ;;  %s3227_s28 = smov 0  }
   0x7 LB: > { %3867 = sst [smem:[#allocation12_spill]] %s3136_s27  ;;  %s3242_s29 = sadd.s32 4294967295, %s3140_s28   ;;  %s3140_s28 = sphi %s3227_s28, %s3880_s28   ;;  %s3136_s27 = sphi %s3225_s27, %s3882_s27   ;;  %s3132_s26 = sphi %s3223_s26, %s3884_s26   ;;  %s3128_s25 = sphi %s3221_s25, %s3883_s25  }
   0x8   : > { %s2520_s30 = sadd.s32 4294967294, %s3140_s28   ;;  %s3246_s14 = sadd.s32 1, %s3140_s28  }
   0x9   : > { %3868 = sst [smem:[#allocation13_spill]] %s3246_s14  ;;  %s282_s15 = sadd.s32 1, %s3136_s27 }
   0xa   : > { %s279_s16 = ssub.s32 %s3140_s28, %s3246_s14  ;;  %p292_p0 = scmp.ne.s32.totalorder %s3136_s27, %s3132_s26 }
   0xb   : > { %p280_p1 = scmp.eq.s32.totalorder %s279_s16, 0  ;;  %p293_p2 = scmp.eq.s32.totalorder %s3242_s29, 1 }
   0xc   : > { %p298_p3 = scmp.ne.s32.totalorder %s3132_s26, %s3128_s25  ;;  %p299_p4 = scmp.eq.s32.totalorder %s2520_s30, 1 }
   0xd   : > { %s3257_s17 = scalar_select %p280_p1, %s3136_s27, %s282_s15  }
   0xe   : > { %p3259_p5 = por %p293_p2, %p292_p0  ;;  %p3263_p6 = por %p299_p4, %p298_p3 }
   0xf   : > { %3869 = sst [smem:[#allocation14_spill]] %s3257_s17  ;;  %p2521_p7 = scmp.ge.s32.totalorder %s3140_s28, 1 }
  0x10   : > { %s3871_s19 = scalar_select %p3263_p6, 1, 0 }
  0x11   : > { %p358_p8 = scmp.lt.s32.totalorder %s3140_s28, 3  ;;  %p3863_p9 = scmp.eq.s32.totalorder %s3242_s29, 0 }
  0x12   : > { %s3142_s21 = smov [#allocation3]   ;;  %s3143_s24 = smov [#allocation6]  }
  0x13   : > { %p3270_p10 = pnand %p2521_p7, %p358_p8  ;;  %s370_s22 = sshll.u32 %s3142_s21, 4  ;;  %s371_s22 = int_to_ptr.vmem [resolvable:$true] %s370_s22 }
  0x14   : > { %s383_s30 = sshll.u32 %s3143_s24, 4  ;;  %s3031_s15 = scalar_lea.vmem %s371_s22, 2048  ;;  %s384_s30 = int_to_ptr.vmem [resolvable:$true] %s383_s30 }
  0x15   : > { %p2680_p11 = pneg %p3270_p10  ;;  %p3032_p0 = scmp.ne.s32.totalorder %s371_s22, %s3031_s15 }
  0x16   : > { %p3039_p3 = scmp.lt.s32.totalorder %s371_s22, %s371_s22  ;;  %p3040_p4 = scmp.lt.s32.totalorder %s3031_s15, %s3031_s15 }
  0x17   : > { %p3278_p12 = pnand %p3863_p9, %p2680_p11 }
  0x18   : > { %p3041_p7 = por %p3040_p4, %p3039_p3 }
  0x19   : > { %p3022_p13 = pneg %p3278_p12 }
  0x1b   : > { %p3034_p1 = pnand %p3032_p0, %p3022_p13 }
  0x1d   : > { %p3035_p2 = pneg %p3034_p1 }
  0x1f   : > { %p3042_p8 = pnand %p3041_p7, %p3035_p2 }
  0x21   : > { %3045 = shalt.err (!%p3042_p8)
}
  0x22   : > { %s3144_s16 = smov 256   ;;  %s3145_s21 = smov 16  }
  0x23   : > { %2683 = dma.hbm_to_vmem [thread:$0]  (!%p3278_p12), %s3851_s3, 2048, %s371_s22, [#allocation4], %s3144_s16, %s3144_s16, %s3145_s21  }
  0x24   : > { %s3057_s27 = scalar_lea.vmem %s384_s30, 4096  ;;  %p3065_p9 = scmp.lt.s32.totalorder %s384_s30, %s384_s30 }
  0x25   : > { %p3058_p11 = scmp.ne.s32.totalorder %s384_s30, %s3057_s27  ;;  %p3066_p6 = scmp.lt.s32.totalorder %s3057_s27, %s3057_s27 }
  0x27   : > { %p3060_p0 = pnand %p3058_p11, %p3022_p13  ;;  %p3067_p3 = por %p3066_p6, %p3065_p9 }
  0x29   : > { %p3061_p1 = pneg %p3060_p0 }
  0x2b   : > { %p3068_p2 = pnand %p3067_p3, %p3061_p1 }
  0x2d   : > { %3071 = shalt.err (!%p3068_p2)
}
  0x2e   : > { %2686 = dma.hbm_to_vmem [thread:$0]  (!%p3278_p12), %s3852_s4, 4096, %s384_s30, [#allocation7], %s3144_s16, %s3144_s16, %s3145_s21  }
  0x2f   : > { %436 = sbr.rel (%p3270_p10) target bundleno = 3483 (0xd9b), region = 64  ;;  %p3874_p4 = scmp.eq.s32.totalorder (!%p3270_p10), %s3242_s29, 0 }
  0x34   : > { %3115 = dma.done.wait (%p3874_p4), [#allocation4], 2048   ;;  %p3875_p13 = pmov %p3874_p4 }
  0x35   : > { %p3876_p7 = pmov %p3874_p4 }
  0x36   : > { %3117 = vsyncadd (%p3875_p13), [#allocation4], 4294965248 }
  0x37   : > { %3119 = dma.done.wait (%p3876_p7), [#allocation7], 4096   ;;  %p3877_p6 = pmov %p3874_p4 }
  0x38   : > { %v3146_v0 = vmov 0   ;;  %v2736_v1 = vld [vmem:[#allocation3 + $0x64] ss:$16 sps:$4 sm:$0xff]   ;;  %p494_p9 = scmp.lt.s32.totalorder %s3242_s29, 1  ;;  %v2740_v3 = vld [vmem:[#allocation3 + $0x60] ss:$16 sps:$4 sm:$0xff]  }
  0x39   : > { %3121 = vsyncadd (%p3877_p6), [#allocation7], 4294963200  ;;  %666 = vmatprep.mubr.bf16.mxu1 %v3146_v0  ;;  %943 = vmatprep.mubr.bf16.mxu0 %v3146_v0  ;;  %v3313_v2 = vld [vmem:[#allocation6 + $0xe4] ss:$16 sps:$4 sm:$0xff]   ;;  %v3315_v4 = vld [vmem:[#allocation6 + $0xe0] ss:$16 sps:$4 sm:$0xff]  }
  0x3a   : > { %642 = vmatprep.subr.bf16.mxu1 %v2736_v1  ;;  %911 = vmatprep.subr.bf16.mxu0 %v3313_v2  ;;  %v2742_v5 = vld [vmem:[#allocation3 + $0x44] ss:$16 sps:$4 sm:$0xff]   ;;  %v2746_v7 = vld [vmem:[#allocation3 + $0x40] ss:$16 sps:$4 sm:$0xff]   ;;  %s3322_s27 = scalar_select %p494_p9, %s3242_s29, 1  ;;  %vm630_vm0 = vcmask 523264   ;;  %v530_v1 = vlaneseq }
  0x3b   : > { %643 = vmatpush1.bf16.msra.mxu1 %v2740_v3  ;;  %912 = vmatpush1.bf16.msra.mxu0 %v3315_v4  ;;  %v3319_v6 = vld [vmem:[#allocation6 + $0xc4] ss:$16 sps:$4 sm:$0xff]   ;;  %v3324_v8 = vld [vmem:[#allocation6 + $0xc0] ss:$16 sps:$4 sm:$0xff]   ;;  %s3878_s0 = sld [smem:[#allocation15_spill]]  ;;  %vm3148_vm1 = vmmov 0  }
  0x3c   : > { %644 = vmatprep.subr.bf16.mxu1 %v2742_v5  ;;  %913 = vmatprep.subr.bf16.mxu0 %v3319_v6  ;;  %v2748_v9 = vld [vmem:[#allocation3 + $0x24] ss:$16 sps:$4 sm:$0xff]   ;;  %v2752_v11 = vld [vmem:[#allocation3 + $0x20] ss:$16 sps:$4 sm:$0xff]   ;;  %s2528_s14 = sshll.u32 %s3322_s27, 2  ;;  %s500_s16 = scalar_lea.vmem %s3849_s1, %s3322_s27  ;;  %v531_v3 = vshrl.u32 %v530_v1, 7 }
  0x3d   : > { %v3327_v10 = vld [vmem:[#allocation6 + $0xa4] ss:$16 sps:$4 sm:$0xff]   ;;  %v3329_v12 = vld [vmem:[#allocation6 + $0xa0] ss:$16 sps:$4 sm:$0xff]   ;;  %v2762_v17 = vld [vmem:[#allocation3 + $0x6c] ss:$16 sps:$4 sm:$0xff]   ;;  %s503_s17 = scalar_lea.vmem %s3850_s2, %s3322_s27 }
  0x3e   : > { %v2754_v13 = vld [vmem:[#allocation3 + $0x4] ss:$16 sps:$4 sm:$0xff]   ;;  %v2758_v15 = vld [vmem:[#allocation3] ss:$16 sps:$4 sm:$0xff]   ;;  %v2760_v20 = vld [vmem:[#allocation3 + $0x68] ss:$16 sps:$4 sm:$0xff]  }
  0x3f   : > { %645 = vmatpush1.bf16.msra.mxu1 %v2746_v7  ;;  %914 = vmatpush1.bf16.msra.mxu0 %v3324_v8  ;;  %v3334_v14 = vld [vmem:[#allocation6 + $0x84] ss:$16 sps:$4 sm:$0xff]   ;;  %v3340_v16 = vld [vmem:[#allocation6 + $0x80] ss:$16 sps:$4 sm:$0xff]   ;;  %v2768_v22 = vld [vmem:[#allocation3 + $0x4c] ss:$16 sps:$4 sm:$0xff]  }
  0x40   : > { %646 = vmatprep.subr.bf16.mxu1 %v2748_v9  ;;  %915 = vmatprep.subr.bf16.mxu0 %v3327_v10  ;;  %v3343_v18 = vld [vmem:[#allocation6 + $0x64] ss:$16 sps:$4 sm:$0xff]   ;;  %v3346_v21 = vld [vmem:[#allocation6 + $0x60] ss:$16 sps:$4 sm:$0xff]   ;;  %v2766_v24 = vld [vmem:[#allocation3 + $0x48] ss:$16 sps:$4 sm:$0xff]  }
  0x41   : > { %s497_s22 = scalar_lea.vmem %s3878_s0, %s2528_s14  ;;  %v3349_v23 = vld [vmem:[#allocation6 + $0x44] ss:$16 sps:$4 sm:$0xff]   ;;  %v3353_v25 = vld [vmem:[#allocation6 + $0x40] ss:$16 sps:$4 sm:$0xff]   ;;  %v2774_v26 = vld [vmem:[#allocation3 + $0x2c] ss:$16 sps:$4 sm:$0xff]   ;;  %s509_s14 = scalar_lea.vmem %s3861_s13, %s3322_s27 }
  0x42   : > { %v511_v19 = vld [vmem:[%s497_s22] sm:$0xf]  ;;  %v3356_v27 = vld [vmem:[#allocation6 + $0x24] ss:$16 sps:$4 sm:$0xff]   ;;  %v3360_v29 = vld [vmem:[#allocation6 + $0x20] ss:$16 sps:$4 sm:$0xff]   ;;  %s506_s22 = scalar_lea.vmem %s3860_s12, %s3322_s27 }
  0x43   : > { %647 = vmatpush1.bf16.msra.mxu1 %v2752_v11  ;;  %916 = vmatpush1.bf16.msra.mxu0 %v3329_v12  ;;  %v2772_v28 = vld [vmem:[#allocation3 + $0x28] ss:$16 sps:$4 sm:$0xff]   ;;  %v2780_v30 = vld [vmem:[#allocation3 + $0xc] ss:$16 sps:$4 sm:$0xff]   ;;  %v3363_v31 = vld [vmem:[#allocation6 + $0x4] ss:$16 sps:$4 sm:$0xff]  }
  0x44   : > { %648 = vmatprep.subr.bf16.mxu1 %v2754_v13  ;;  %917 = vmatprep.subr.bf16.mxu0 %v3334_v14  ;;  %v2778_v32 = vld [vmem:[#allocation3 + $0x8] ss:$16 sps:$4 sm:$0xff]   ;;  %v3370_v33 = vld [vmem:[#allocation6] ss:$16 sps:$4 sm:$0xff]   ;;  %v3373_v35 = vld [vmem:[#allocation6 + $0xec] ss:$16 sps:$4 sm:$0xff]  }
  0x45   : > { %v748_v34 = vld [vmem:[%s500_s16] sm:$0x1]  ;;  %v3378_v38 = vld [vmem:[#allocation6 + $0xcc] ss:$16 sps:$4 sm:$0xff]   ;;  %v536_v5 = vsub.s32 1, %v531_v3  ;;  %v532_v9 = vsub.s32 0, %v531_v3 }
  0x46   : > { %v750_v36 = vpack.c.bf16 %v748_v34, %v748_v34  ;;  %v3376_v37 = vld [vmem:[#allocation6 + $0xe8] ss:$16 sps:$4 sm:$0xff]   ;;  %v3385_v40 = vld [vmem:[#allocation6 + $0xac] ss:$16 sps:$4 sm:$0xff]   ;;  %s3149_s21 = smov 96   ;;  %vm2196_vm3 = vcmask 1040384  }
  0x47   : > { %649 = vmatpush1.bf16.msra.mxu1 %v2758_v15  ;;  %918 = vmatpush1.bf16.msra.mxu0 %v3340_v16  ;;  %v3382_v39 = vld [vmem:[#allocation6 + $0xc8] ss:$16 sps:$4 sm:$0xff]   ;;  %v3397_v42 = vld [vmem:[#allocation6 + $0x8c] ss:$16 sps:$4 sm:$0xff]   ;;  %v544_v15 = vsub.s32 3, %v531_v3  ;;  %vm2198_vm4 = vcmask 1041408  }
  0x48   : > { %683 = vmatprep.subr.bf16.mxu1 %v2762_v17  ;;  %919 = vmatprep.subr.bf16.mxu0 %v3343_v18  ;;  %v3394_v41 = vld [vmem:[#allocation6 + $0xa8] ss:$16 sps:$4 sm:$0xff]   ;;  %v3405_v44 = vld [vmem:[#allocation6 + $0x6c] ss:$16 sps:$4 sm:$0xff]   ;;  %vm2200_vm5 = vcmask 1042432   ;;  %vm2202_vm6 = vcmask 1043456  }
  0x49   : > { %v3402_v43 = vld [vmem:[#allocation6 + $0x88] ss:$16 sps:$4 sm:$0xff]   ;;  %v3413_v46 = vld [vmem:[#allocation6 + $0x4c] ss:$16 sps:$4 sm:$0xff]   ;;  %vm2204_vm7 = vcmask 1044480   ;;  %vm2206_vm8 = vcmask 259072  }
  0x4a   : > { %2545 = vmatmul.mubr.msk.bf16.vlgmr.msra.gmra.mxu1 %vm630_vm0, %v511_v19  ;;  %v3410_v45 = vld [vmem:[#allocation6 + $0x68] ss:$16 sps:$4 sm:$0xff]   ;;  %v3421_v48 = vld [vmem:[#allocation6 + $0x2c] ss:$16 sps:$4 sm:$0xff]   ;;  %vm2274_vm9 = vcmask 1046528   ;;  %vm2256_vm14 = vcmask 7168  }
  0x4b   : > { %684 = vmatpush1.bf16.msra.mxu1 %v2760_v20  ;;  %920 = vmatpush1.bf16.msra.mxu0 %v3346_v21  ;;  %v3418_v47 = vld [vmem:[#allocation6 + $0x48] ss:$16 sps:$4 sm:$0xff]   ;;  %v3429_v50 = vld [vmem:[#allocation6 + $0xc] ss:$16 sps:$4 sm:$0xff]   ;;  %vm2258_vm15 = vcmask 15360   ;;  %s482_s20 = sand.u32 1, %s3132_s26  }
  0x4c   : > { %685 = vmatprep.subr.bf16.mxu1 %v2768_v22  ;;  %921 = vmatprep.subr.bf16.mxu0 %v3349_v23  ;;  %v3426_v49 = vld [vmem:[#allocation6 + $0x28] ss:$16 sps:$4 sm:$0xff]   ;;  %s483_s23 = scalar_lea.vmem [#allocation8], %s482_s20  ;;  %s2363_s24 = scalar_lea.sflag [#allocation5], %s482_s20 }
  0x4d   : > { %707 = vmatprep.mubr.bf16.mxu1 %v3146_v0  ;;  %v3434_v51 = vld [vmem:[#allocation6 + $0x8] ss:$16 sps:$4 sm:$0xff]   ;;  %s2381_s30 = sshll.u32 %s483_s23, 4  ;;  %s2382_s30 = int_to_ptr.vmem [resolvable:$true] %s2381_s30 }
  0x4e   : > { %v528_v7 = vld [vmem:[%s3853_s5] sm:$0xf]  ;;  %s3072_s15 = scalar_lea.vmem %s2382_s30, 16 }
  0x4f   : > { %686 = vmatpush1.bf16.msra.mxu1 %v2766_v24  ;;  %922 = vmatpush1.bf16.msra.mxu0 %v3353_v25  ;;  %v537_v11 = vrot.slane %v528_v7, %v536_v5  ;;  %v533_v13 = vrot.slane %v528_v7, %v532_v9  ;;  %v545_v20 = vrot.slane %v528_v7, %v544_v15  ;;  %v749_v15 = vld [vmem:[%s503_s17] sm:$0x1]  ;;  %p3073_p10 = scmp.ne.s32.totalorder %s2382_s30, %s3072_s15 }
  0x50   : > { %687 = vmatprep.subr.bf16.mxu1 %v2774_v26  ;;  %923 = vmatprep.subr.bf16.mxu0 %v3356_v27 }
  0x51   : > { %p3074_p12 = pnand %p3073_p10, %p3259_p5 }
  0x53   : > { %688 = vmatpush1.bf16.msra.mxu1 %v2772_v28  ;;  %924 = vmatpush1.bf16.msra.mxu0 %v3360_v29  ;;  %p3075_p8 = pneg %p3074_p12 }
  0x54   : > { %689 = vmatprep.subr.bf16.mxu1 %v2780_v30  ;;  %925 = vmatprep.subr.bf16.mxu0 %v3363_v31 }
  0x57   : > { %690 = vmatpush1.bf16.msra.mxu1 %v2778_v32  ;;  %926 = vmatpush1.bf16.msra.mxu0 %v3370_v33 }
  0x58   : > { %952 = vmatprep.subr.bf16.mxu1 %v3373_v35  ;;  %1030 = vmatprep.subr.bf16.mxu0 %v3313_v2 }
  0x5a   : > { %2546 = vmatmul.mubr.msk.bf16.vlgmr.msra.gmra.mxu1 %vm630_vm0, %v511_v19  ;;  %944 = vmatmul.mubr.bf16.vlgmr.msra.gmra.mxu0 %v750_v36  ;;  %vm2260_vm0 = vcmask 23552  }
  0x5b   : > { %953 = vmatpush1.bf16.msra.mxu1 %v3376_v37  ;;  %984 = vmatprep.mubr.bf16.mxu1 %v3146_v0 }
  0x5c   : > { %954 = vmatprep.subr.bf16.mxu1 %v3378_v38  ;;  %1031 = vmatpush1.bf16.msra.mxu0 %v3315_v4 }
  0x5d   : > { %1032 = vmatprep.subr.bf16.mxu0 %v3319_v6  ;;  %1062 = vmatprep.mubr.bf16.mxu0 %v3146_v0 }
  0x5f   : > { %955 = vmatpush1.bf16.msra.mxu1 %v3382_v39 }
  0x60   : > { %956 = vmatprep.subr.bf16.mxu1 %v3385_v40  ;;  %1033 = vmatpush1.bf16.msra.mxu0 %v3324_v8 }
  0x61   : > { %1034 = vmatprep.subr.bf16.mxu0 %v3327_v10 }
  0x63   : > { %957 = vmatpush1.bf16.msra.mxu1 %v3394_v41 }
  0x64   : > { %958 = vmatprep.subr.bf16.mxu1 %v3397_v42  ;;  %1035 = vmatpush1.bf16.msra.mxu0 %v3329_v12 }
  0x65   : > { %1036 = vmatprep.subr.bf16.mxu0 %v3334_v14 }
  0x67   : > { %959 = vmatpush1.bf16.msra.mxu1 %v3402_v43 }
  0x68   : > { %960 = vmatprep.subr.bf16.mxu1 %v3405_v44  ;;  %1037 = vmatpush1.bf16.msra.mxu0 %v3340_v16 }
  0x69   : > { %1038 = vmatprep.subr.bf16.mxu0 %v3343_v18 }
  0x6b   : > { %961 = vmatpush1.bf16.msra.mxu1 %v3410_v45 }
  0x6c   : > { %962 = vmatprep.subr.bf16.mxu1 %v3413_v46  ;;  %1039 = vmatpush1.bf16.msra.mxu0 %v3346_v21 }
  0x6d   : > { %1040 = vmatprep.subr.bf16.mxu0 %v3349_v23 }
  0x6f   : > { %963 = vmatpush1.bf16.msra.mxu1 %v3418_v47 }
  0x70   : > { %964 = vmatprep.subr.bf16.mxu1 %v3421_v48  ;;  %1041 = vmatpush1.bf16.msra.mxu0 %v3353_v25 }
  0x71   : > { %1042 = vmatprep.subr.bf16.mxu0 %v3356_v27 }
  0x73   : > { %965 = vmatpush1.bf16.msra.mxu1 %v3426_v49 }
  0x74   : > { %966 = vmatprep.subr.bf16.mxu1 %v3429_v50  ;;  %1043 = vmatpush1.bf16.msra.mxu0 %v3360_v29 }
  0x75   : > { %1044 = vmatprep.subr.bf16.mxu0 %v3363_v31 }
  0x77   : > { %967 = vmatpush1.bf16.msra.mxu1 %v3434_v51 }
  0x78   : > { %1071 = vmatprep.subr.bf16.mxu1 %v3373_v35  ;;  %1045 = vmatpush1.bf16.msra.mxu0 %v3370_v33 }
  0x79   : > { %1168 = vmatprep.subr.bf16.mxu0 %v3313_v2 }
  0x7a   : > { %985 = vmatmul.mubr.bf16.vlgmr.msra.gmra.mxu1 %v750_v36 }
  0x7b   : > { %1072 = vmatpush1.bf16.msra.mxu1 %v3376_v37  ;;  %1103 = vmatprep.mubr.bf16.mxu1 %v3146_v0 }
  0x7c   : > { %1073 = vmatprep.subr.bf16.mxu1 %v3378_v38 }
  0x7f   : > { %1074 = vmatpush1.bf16.msra.mxu1 %v3382_v39 }
  0x80   : > { %1075 = vmatprep.subr.bf16.mxu1 %v3385_v40 }
  0x83   : > { %1076 = vmatpush1.bf16.msra.mxu1 %v3394_v41 }
  0x84   : > { %1077 = vmatprep.subr.bf16.mxu1 %v3397_v42 }
  0x87   : > { %1078 = vmatpush1.bf16.msra.mxu1 %v3402_v43 }
  0x88   : > { %1079 = vmatprep.subr.bf16.mxu1 %v3405_v44 }
  0x8b   : > { %1080 = vmatpush1.bf16.msra.mxu1 %v3410_v45 }
  0x8c   : > { %1081 = vmatprep.subr.bf16.mxu1 %v3413_v46 }
  0x8f   : > { %1082 = vmatpush1.bf16.msra.mxu1 %v3418_v47 }
  0x90   : > { %1083 = vmatprep.subr.bf16.mxu1 %v3421_v48 }
  0x93   : > { %1084 = vmatpush1.bf16.msra.mxu1 %v3426_v49 }
  0x94   : > { %1085 = vmatprep.subr.bf16.mxu1 %v3429_v50 }
  0x97   : > { %1086 = vmatpush1.bf16.msra.mxu1 %v3434_v51 }
  0x98   : > { %1209 = vmatprep.subr.bf16.mxu1 %v3373_v35 }
 0x10a   : > { %v668_v52 = vpop.f32.mrf.mxu1 }
 0x10b   : > { %v3466_v19 = vadd.f32 %v668_v52, %v533_v13 }
 0x10c   : > { %v670_v53 = vpop.f32.mrf.mxu1 }
 0x10d   : > { %v3464_v17 = vadd.f32 %v670_v53, %v537_v11  ;;  %v540_v53 = vsub.s32 2, %v531_v3 }
 0x10e   : > { %v672_v54 = vpop.f32.mrf.mxu1 }
 0x110   : > { %v673_v55 = vpop.f32.mrf.mxu1 }
 0x11a   : > { %v709_v56 = vpop.f32.mrf.mxu1  ;;  %v945_v57 = vpop.f32.mrf.mxu0 }
 0x11b   : > { %v993_v24 = vadd.f32 %v945_v57, %v3466_v19 }
 0x11c   : > { %v711_v58 = vpop.f32.mrf.mxu1  ;;  %v947_v59 = vpop.f32.mrf.mxu0 }
 0x11d   : > { %v994_v22 = vadd.f32 %v947_v59, %v3464_v17  ;;  %v3470_v28 = vadd.f32 %v711_v58, %v545_v20  ;;  %v2579_v32 = vmul.f32 -1.442695, %v993_v24 }
 0x11e   : > { %v713_v60 = vpop.f32.mrf.mxu1  ;;  %v949_v61 = vpop.f32.mrf.mxu0 }
 0x11f   : > { %v2580_v30 = vmul.f32 -1.442695, %v994_v22  ;;  %v541_v60 = vrot.slane %v528_v7, %v540_v53 }
 0x120   : > { %v714_v62 = vpop.f32.mrf.mxu1  ;;  %v950_v63 = vpop.f32.mrf.mxu0 }
 0x121   : > { %2816 = vpow2.f32 %v2580_v30  ;;  %v3473_v59 = vadd.f32 %v709_v56, %v541_v60 }
 0x122   : > { %2818 = vpow2.f32 %v2579_v32 }
 0x12e   : > { %v2817_v58 = vpop.eup %2816 }
 0x12f   : > { %v2819_v61 = vpop.eup %2818  ;;  %v1010_v5 = vadd.f32 1.0, %v2817_v58 }
 0x130   : > { %v1009_v11 = vadd.f32 1.0, %v2819_v61 }
 0x13a   : > { %v986_v26 = vpop.f32.mrf.mxu1 }
 0x13b   : > { %v995_v57 = vadd.f32 %v986_v26, %v3473_v59 }
 0x13c   : > { %v988_v34 = vpop.f32.mrf.mxu1 }
 0x13d   : > { %v996_v36 = vadd.f32 %v988_v34, %v3470_v28  ;;  %v2581_v63 = vmul.f32 -1.442695, %v995_v57 }
 0x13e   : > { %v990_v54 = vpop.f32.mrf.mxu1 }
 0x13f   : > { %v2582_v55 = vmul.f32 -1.442695, %v996_v36 }
 0x140   : > { %v991_v52 = vpop.f32.mrf.mxu1 }
 0x141   : > { %2820 = vpow2.f32 %v2582_v55 }
 0x14e   : > { %v2821_v62 = vpop.eup %2820 }
 0x14f   : > { %v1012_v9 = vadd.f32 1.0, %v2821_v62 }
 0x151   : > { %2822 = vrcp.f32 %v1012_v9 }
 0x152   : > { %2824 = vpow2.f32 %v2581_v63 }
 0x153   : > { %2826 = vrcp.f32 %v1010_v5 }
 0x154   : > { %2828 = vrcp.f32 %v1009_v11 }
 0x15e   : > { %v2823_v3 = vpop.eup %2822 }
 0x15f   : > { %v2825_v56 = vpop.eup %2824  ;;  %v1021_v7 = vmul.f32 2.0, %v2823_v3 }
 0x160   : > { %v2827_v13 = vpop.eup %2826  ;;  %v1011_v24 = vadd.f32 1.0, %v2825_v56 }
 0x161   : > { %v2583_v20 = vadd.f32 -1.0, %v1021_v7  ;;  %v2829_v22 = vpop.eup %2828  ;;  %v1023_v26 = vmul.f32 %v2827_v13, %v749_v15 }
 0x162   : > { %2830 = vrcp.f32 %v1011_v24 }
 0x163   : > { %v1024_v30 = vmul.f32 %v2829_v22, %v2583_v20 }
 0x165   : > { %v3480_v32 = vadd.f32 %v1024_v30, %v1023_v26 }
 0x167   : > { %2832 = vtanh.f32 %v3480_v32 }
 0x16f   : > { %v2831_v34 = vpop.eup %2830 }
 0x174   : > { %v2833_v36 = vpop.eup %2832 }
 0x175   : > { %v1027_v54 = vmul.f32 %v2833_v36, %v2831_v34 }
 0x177   : > { %1028 = vst [vmem:[#allocation2] sm:$0x1] %v1027_v54  ;;  %v1029_v55 = vpack.c.bf16 %v1027_v54, %v1027_v54 }
 0x179   : > { %1063 = vmatmul.mubr.bf16.vlgmr.msra.gmra.mxu0 %v1029_v55  ;;  %1104 = vmatmul.mubr.bf16.vlgmr.msra.gmra.mxu1 %v1029_v55 }
 0x17a   : > { %1169 = vmatpush1.bf16.msra.mxu0 %v3315_v4  ;;  %1210 = vmatpush1.bf16.msra.mxu1 %v3376_v37 }
 0x17b   : > { %1170 = vmatprep.subr.bf16.mxu0 %v3319_v6  ;;  %1211 = vmatprep.subr.bf16.mxu1 %v3378_v38 }
 0x17c   : > { %1200 = vmatprep.mubr.bf16.mxu0 %v3146_v0  ;;  %1241 = vmatprep.mubr.bf16.mxu1 %v3146_v0 }
 0x17e   : > { %1171 = vmatpush1.bf16.msra.mxu0 %v3324_v8  ;;  %1212 = vmatpush1.bf16.msra.mxu1 %v3382_v39 }
 0x17f   : > { %1172 = vmatprep.subr.bf16.mxu0 %v3327_v10  ;;  %1213 = vmatprep.subr.bf16.mxu1 %v3385_v40 }
 0x182   : > { %1173 = vmatpush1.bf16.msra.mxu0 %v3329_v12  ;;  %1214 = vmatpush1.bf16.msra.mxu1 %v3394_v41 }
 0x183   : > { %1174 = vmatprep.subr.bf16.mxu0 %v3334_v14  ;;  %1215 = vmatprep.subr.bf16.mxu1 %v3397_v42 }
 0x186   : > { %1175 = vmatpush1.bf16.msra.mxu0 %v3340_v16  ;;  %1216 = vmatpush1.bf16.msra.mxu1 %v3402_v43 }
 0x187   : > { %1176 = vmatprep.subr.bf16.mxu0 %v3343_v18  ;;  %1217 = vmatprep.subr.bf16.mxu1 %v3405_v44 }
 0x18a   : > { %1177 = vmatpush1.bf16.msra.mxu0 %v3346_v21  ;;  %1218 = vmatpush1.bf16.msra.mxu1 %v3410_v45 }
 0x18b   : > { %1178 = vmatprep.subr.bf16.mxu0 %v3349_v23  ;;  %1219 = vmatprep.subr.bf16.mxu1 %v3413_v46 }
 0x18e   : > { %1179 = vmatpush1.bf16.msra.mxu0 %v3353_v25  ;;  %1220 = vmatpush1.bf16.msra.mxu1 %v3418_v47 }
 0x18f   : > { %1180 = vmatprep.subr.bf16.mxu0 %v3356_v27  ;;  %1221 = vmatprep.subr.bf16.mxu1 %v3421_v48 }
 0x192   : > { %1181 = vmatpush1.bf16.msra.mxu0 %v3360_v29  ;;  %1222 = vmatpush1.bf16.msra.mxu1 %v3426_v49 }
 0x193   : > { %1182 = vmatprep.subr.bf16.mxu0 %v3363_v31  ;;  %1223 = vmatprep.subr.bf16.mxu1 %v3429_v50 }
 0x196   : > { %1183 = vmatpush1.bf16.msra.mxu0 %v3370_v33  ;;  %1224 = vmatpush1.bf16.msra.mxu1 %v3434_v51 }
 0x197   : > { %1305 = vmatprep.subr.bf16.mxu0 %v3313_v2  ;;  %1346 = vmatprep.subr.bf16.mxu1 %v3373_v35 }
 0x239   : > { %v1064_v53 = vpop.f32.mrf.mxu0  ;;  %v1105_v52 = vpop.f32.mrf.mxu1 }
 0x23a   : > { %v1116_v60 = vrot.slane %v1064_v53, 7  ;;  %v1118_v22 = vrot.slane %v1105_v52, 7 }
 0x23b   : > { %v1066_v57 = vpop.f32.mrf.mxu0  ;;  %v1107_v58 = vpop.f32.mrf.mxu1 }
 0x23c   : > { %v1124_v61 = vadd.f32 %v1116_v60, %v3466_v19  ;;  %v1117_v62 = vrot.slane %v1066_v57, 7  ;;  %v1119_v63 = vrot.slane %v1107_v58, 7  ;;  %v1126_v24 = vadd.f32 %v1118_v22, %v3473_v59 }
 0x23d   : > { %v1068_v5 = vpop.f32.mrf.mxu0  ;;  %v1109_v9 = vpop.f32.mrf.mxu1 }
 0x23e   : > { %v2584_v11 = vmul.f32 -1.442695, %v1124_v61  ;;  %v1125_v3 = vadd.f32 %v1117_v62, %v3464_v17  ;;  %v1127_v56 = vadd.f32 %v1119_v63, %v3470_v28  ;;  %v2586_v36 = vmul.f32 -1.442695, %v1126_v24 }
 0x23f   : > { %v1069_v7 = vpop.f32.mrf.mxu0  ;;  %v1110_v13 = vpop.f32.mrf.mxu1  ;;  %v1155_v62 = vrot.slane %v3480_v32, 7 }
 0x240   : > { %v2585_v15 = vmul.f32 -1.442695, %v1125_v3  ;;  %v2587_v20 = vmul.f32 -1.442695, %v1127_v56  ;;  %2834 = vpow2.f32 %v2584_v11 }
 0x242   : > { %2836 = vpow2.f32 %v2585_v15 }
 0x243   : > { %2838 = vpow2.f32 %v2587_v20 }
 0x24d   : > { %v2835_v26 = vpop.eup %2834 }
 0x24e   : > { %v1140_v53 = vadd.f32 1.0, %v2835_v26 }
 0x24f   : > { %v2837_v30 = vpop.eup %2836 }
 0x250   : > { %v2839_v34 = vpop.eup %2838  ;;  %v1141_v54 = vadd.f32 1.0, %v2837_v30 }
 0x251   : > { %v1143_v55 = vadd.f32 1.0, %v2839_v34 }
 0x253   : > { %2840 = vrcp.f32 %v1143_v55 }
 0x254   : > { %2842 = vpow2.f32 %v2586_v36 }
 0x255   : > { %2844 = vrcp.f32 %v1141_v54 }
 0x256   : > { %2846 = vrcp.f32 %v1140_v53 }
 0x260   : > { %v2841_v60 = vpop.eup %2840 }
 0x261   : > { %v2843_v57 = vpop.eup %2842  ;;  %v1152_v58 = vmul.f32 2.0, %v2841_v60 }
 0x262   : > { %v2845_v61 = vpop.eup %2844  ;;  %v1142_v5 = vadd.f32 1.0, %v2843_v57 }
 0x263   : > { %v2588_v52 = vadd.f32 -1.0, %v1152_v58  ;;  %v2847_v63 = vpop.eup %2846  ;;  %v1157_v9 = vmul.f32 %v2845_v61, %v1155_v62 }
 0x264   : > { %2848 = vrcp.f32 %v1142_v5 }
 0x265   : > { %v1158_v11 = vmul.f32 %v2847_v63, %v2588_v52 }
 0x267   : > { %v3522_v3 = vadd.f32 %v1158_v11, %v1157_v9 }
 0x269   : > { %2850 = vtanh.f32 %v3522_v3 }
 0x271   : > { %v2849_v56 = vpop.eup %2848 }
 0x276   : > { %v2851_v7 = vpop.eup %2850 }
 0x277   : > { %v1161_v13 = vmul.f32 %v2851_v7, %v2849_v56 }
 0x279   : > { %1162 = vst [vmem:[#allocation2] sm:$0x2] %v1161_v13  ;;  %v1163_v15 = vpack.c.bf16 %v1161_v13, %v1161_v13 }
 0x27b   : > { %v1165_v20 = vshrl.u32 %v1163_v15, 16 }
 0x27d   : > { %1201 = vmatmul.mubr.bf16.vlgmr.msra.gmra.mxu0 %v1165_v20  ;;  %1242 = vmatmul.mubr.bf16.vlgmr.msra.gmra.mxu1 %v1165_v20 }
 0x27e   : > { %1306 = vmatpush1.bf16.msra.mxu0 %v3315_v4  ;;  %1347 = vmatpush1.bf16.msra.mxu1 %v3376_v37 }
 0x27f   : > { %1307 = vmatprep.subr.bf16.mxu0 %v3319_v6  ;;  %1348 = vmatprep.subr.bf16.mxu1 %v3378_v38 }
 0x280   : > { %1337 = vmatprep.mubr.bf16.mxu0 %v3146_v0  ;;  %1378 = vmatprep.mubr.bf16.mxu1 %v3146_v0 }
 0x282   : > { %1308 = vmatpush1.bf16.msra.mxu0 %v3324_v8  ;;  %1349 = vmatpush1.bf16.msra.mxu1 %v3382_v39 }
 0x283   : > { %1309 = vmatprep.subr.bf16.mxu0 %v3327_v10  ;;  %1350 = vmatprep.subr.bf16.mxu1 %v3385_v40 }
 0x286   : > { %1310 = vmatpush1.bf16.msra.mxu0 %v3329_v12  ;;  %1351 = vmatpush1.bf16.msra.mxu1 %v3394_v41 }
 0x287   : > { %1311 = vmatprep.subr.bf16.mxu0 %v3334_v14  ;;  %1352 = vmatprep.subr.bf16.mxu1 %v3397_v42 }
 0x28a   : > { %1312 = vmatpush1.bf16.msra.mxu0 %v3340_v16  ;;  %1353 = vmatpush1.bf16.msra.mxu1 %v3402_v43 }
 0x28b   : > { %1313 = vmatprep.subr.bf16.mxu0 %v3343_v18  ;;  %1354 = vmatprep.subr.bf16.mxu1 %v3405_v44 }
 0x28e   : > { %1314 = vmatpush1.bf16.msra.mxu0 %v3346_v21  ;;  %1355 = vmatpush1.bf16.msra.mxu1 %v3410_v45 }
 0x28f   : > { %1315 = vmatprep.subr.bf16.mxu0 %v3349_v23  ;;  %1356 = vmatprep.subr.bf16.mxu1 %v3413_v46 }
 0x292   : > { %1316 = vmatpush1.bf16.msra.mxu0 %v3353_v25  ;;  %1357 = vmatpush1.bf16.msra.mxu1 %v3418_v47 }
 0x293   : > { %1317 = vmatprep.subr.bf16.mxu0 %v3356_v27  ;;  %1358 = vmatprep.subr.bf16.mxu1 %v3421_v48 }
 0x296   : > { %1318 = vmatpush1.bf16.msra.mxu0 %v3360_v29  ;;  %1359 = vmatpush1.bf16.msra.mxu1 %v3426_v49 }
 0x297   : > { %1319 = vmatprep.subr.bf16.mxu0 %v3363_v31  ;;  %1360 = vmatprep.subr.bf16.mxu1 %v3429_v50 }
 0x29a   : > { %1320 = vmatpush1.bf16.msra.mxu0 %v3370_v33  ;;  %1361 = vmatpush1.bf16.msra.mxu1 %v3434_v51 }
 0x29b   : > { %1444 = vmatprep.subr.bf16.mxu0 %v3313_v2  ;;  %1485 = vmatprep.subr.bf16.mxu1 %v3373_v35 }
 0x33d   : > { %v1202_v32 = vpop.f32.mrf.mxu0  ;;  %v1243_v22 = vpop.f32.mrf.mxu1 }
 0x33e   : > { %v1254_v24 = vrot.slane %v1202_v32, 6  ;;  %v1256_v5 = vrot.slane %v1243_v22, 6 }
 0x33f   : > { %v1204_v26 = vpop.f32.mrf.mxu0  ;;  %v1245_v30 = vpop.f32.mrf.mxu1 }
 0x340   : > { %v1262_v34 = vadd.f32 %v1254_v24, %v3466_v19  ;;  %v1255_v36 = vrot.slane %v1204_v26, 6  ;;  %v1257_v54 = vrot.slane %v1245_v30, 6  ;;  %v1264_v9 = vadd.f32 %v1256_v5, %v3473_v59 }
 0x341   : > { %v1206_v55 = vpop.f32.mrf.mxu0  ;;  %v1247_v53 = vpop.f32.mrf.mxu1 }
 0x342   : > { %v2589_v60 = vmul.f32 -1.442695, %v1262_v34  ;;  %v1263_v57 = vadd.f32 %v1255_v36, %v3464_v17  ;;  %v1265_v58 = vadd.f32 %v1257_v54, %v3470_v28  ;;  %v2591_v13 = vmul.f32 -1.442695, %v1264_v9 }
 0x343   : > { %v1207_v61 = vpop.f32.mrf.mxu0  ;;  %v1248_v62 = vpop.f32.mrf.mxu1  ;;  %v1293_v36 = vrot.slane %v3522_v3, 7 }
 0x344   : > { %v2590_v52 = vmul.f32 -1.442695, %v1263_v57  ;;  %v2592_v63 = vmul.f32 -1.442695, %v1265_v58  ;;  %2852 = vpow2.f32 %v2589_v60 }
 0x346   : > { %2854 = vpow2.f32 %v2590_v52 }
 0x347   : > { %2856 = vpow2.f32 %v2592_v63 }
 0x351   : > { %v2853_v11 = vpop.eup %2852 }
 0x352   : > { %v1278_v32 = vadd.f32 1.0, %v2853_v11 }
 0x353   : > { %v2855_v56 = vpop.eup %2854 }
 0x354   : > { %v2857_v7 = vpop.eup %2856  ;;  %v1279_v15 = vadd.f32 1.0, %v2855_v56 }
 0x355   : > { %v1281_v20 = vadd.f32 1.0, %v2857_v7 }
 0x357   : > { %2858 = vrcp.f32 %v1281_v20 }
 0x358   : > { %2860 = vpow2.f32 %v2591_v13 }
 0x359   : > { %2862 = vrcp.f32 %v1279_v15 }
 0x35a   : > { %2864 = vrcp.f32 %v1278_v32 }
 0x364   : > { %v2859_v24 = vpop.eup %2858 }
 0x365   : > { %v2861_v26 = vpop.eup %2860  ;;  %v1290_v30 = vmul.f32 2.0, %v2859_v24 }
 0x366   : > { %v2863_v34 = vpop.eup %2862  ;;  %v1280_v55 = vadd.f32 1.0, %v2861_v26 }
 0x367   : > { %v2593_v22 = vadd.f32 -1.0, %v1290_v30  ;;  %v2865_v54 = vpop.eup %2864  ;;  %v1295_v53 = vmul.f32 %v2863_v34, %v1293_v36 }
 0x368   : > { %2866 = vrcp.f32 %v1280_v55 }
 0x369   : > { %v1296_v60 = vmul.f32 %v2865_v54, %v2593_v22 }
 0x36b   : > { %v3564_v57 = vadd.f32 %v1296_v60, %v1295_v53 }
 0x36d   : > { %2868 = vtanh.f32 %v3564_v57 }
 0x375   : > { %v2867_v58 = vpop.eup %2866 }
 0x37a   : > { %v2869_v61 = vpop.eup %2868 }
 0x37b   : > { %v1299_v62 = vmul.f32 %v2869_v61, %v2867_v58 }
 0x37d   : > { %1300 = vst [vmem:[#allocation2] sm:$0x4] %v1299_v62  ;;  %v1301_v52 = vpack.c.bf16 %v1299_v62, %v1299_v62  ;;  %v1430_v62 = vrot.slane %v3564_v57, 7  ;;  %v3609_v57 = vld [vmem:[#allocation6 + $0xe0] ss:$16 sps:$4 sm:$0xff]  }
 0x37f   : > { %v1303_v63 = vrot.slane %v1301_v52, 1 }
 0x381   : > { %1338 = vmatmul.mubr.bf16.vlgmr.msra.gmra.mxu0 %v1303_v63  ;;  %1379 = vmatmul.mubr.bf16.vlgmr.msra.gmra.mxu1 %v1303_v63 }
 0x382   : > { %1445 = vmatpush1.bf16.msra.mxu0 %v3315_v4  ;;  %1486 = vmatpush1.bf16.msra.mxu1 %v3376_v37 }
 0x383   : > { %1446 = vmatprep.subr.bf16.mxu0 %v3319_v6  ;;  %1487 = vmatprep.subr.bf16.mxu1 %v3378_v38 }
 0x384   : > { %1476 = vmatprep.mubr.bf16.mxu0 %v3146_v0  ;;  %1517 = vmatprep.mubr.bf16.mxu1 %v3146_v0 }
 0x386   : > { %1447 = vmatpush1.bf16.msra.mxu0 %v3324_v8  ;;  %1488 = vmatpush1.bf16.msra.mxu1 %v3382_v39 }
 0x387   : > { %1448 = vmatprep.subr.bf16.mxu0 %v3327_v10  ;;  %1489 = vmatprep.subr.bf16.mxu1 %v3385_v40 }
 0x38a   : > { %1449 = vmatpush1.bf16.msra.mxu0 %v3329_v12  ;;  %1490 = vmatpush1.bf16.msra.mxu1 %v3394_v41 }
 0x38b   : > { %1450 = vmatprep.subr.bf16.mxu0 %v3334_v14  ;;  %1491 = vmatprep.subr.bf16.mxu1 %v3397_v42 }
 0x38e   : > { %1451 = vmatpush1.bf16.msra.mxu0 %v3340_v16  ;;  %1492 = vmatpush1.bf16.msra.mxu1 %v3402_v43 }
 0x38f   : > { %1452 = vmatprep.subr.bf16.mxu0 %v3343_v18  ;;  %1493 = vmatprep.subr.bf16.mxu1 %v3405_v44 }
 0x392   : > { %1453 = vmatpush1.bf16.msra.mxu0 %v3346_v21  ;;  %1494 = vmatpush1.bf16.msra.mxu1 %v3410_v45 }
 0x393   : > { %1454 = vmatprep.subr.bf16.mxu0 %v3349_v23  ;;  %1495 = vmatprep.subr.bf16.mxu1 %v3413_v46 }
 0x396   : > { %1455 = vmatpush1.bf16.msra.mxu0 %v3353_v25  ;;  %1496 = vmatpush1.bf16.msra.mxu1 %v3418_v47 }
 0x397   : > { %1456 = vmatprep.subr.bf16.mxu0 %v3356_v27  ;;  %1497 = vmatprep.subr.bf16.mxu1 %v3421_v48 }
 0x39a   : > { %1457 = vmatpush1.bf16.msra.mxu0 %v3360_v29  ;;  %1498 = vmatpush1.bf16.msra.mxu1 %v3426_v49 }
 0x39b   : > { %1458 = vmatprep.subr.bf16.mxu0 %v3363_v31  ;;  %1499 = vmatprep.subr.bf16.mxu1 %v3429_v50 }
 0x39e   : > { %1459 = vmatpush1.bf16.msra.mxu0 %v3370_v33  ;;  %1500 = vmatpush1.bf16.msra.mxu1 %v3434_v51 }
 0x39f   : > { %1581 = vmatprep.subr.bf16.mxu0 %v3313_v2  ;;  %1622 = vmatprep.subr.bf16.mxu1 %v3373_v35 }
 0x441   : > { %v1339_v4 = vpop.f32.mrf.mxu0  ;;  %v1380_v6 = vpop.f32.mrf.mxu1 }
 0x442   : > { %v1391_v8 = vrot.slane %v1339_v4, 5  ;;  %v1393_v32 = vrot.slane %v1380_v6, 5 }
 0x443   : > { %v1341_v10 = vpop.f32.mrf.mxu0  ;;  %v1382_v12 = vpop.f32.mrf.mxu1 }
 0x444   : > { %v1399_v14 = vadd.f32 %v1391_v8, %v3466_v19  ;;  %v1392_v16 = vrot.slane %v1341_v10, 5  ;;  %v1394_v3 = vrot.slane %v1382_v12, 5  ;;  %v1401_v24 = vadd.f32 %v1393_v32, %v3473_v59 }
 0x445   : > { %v1343_v5 = vpop.f32.mrf.mxu0  ;;  %v1384_v9 = vpop.f32.mrf.mxu1 }
 0x446   : > { %v2594_v11 = vmul.f32 -1.442695, %v1399_v14  ;;  %v1400_v56 = vadd.f32 %v1392_v16, %v3464_v17  ;;  %v1402_v7 = vadd.f32 %v1394_v3, %v3470_v28  ;;  %v2596_v36 = vmul.f32 -1.442695, %v1401_v24 }
 0x447   : > { %v1344_v13 = vpop.f32.mrf.mxu0  ;;  %v1385_v2 = vpop.f32.mrf.mxu1 }
 0x448   : > { %v2595_v15 = vmul.f32 -1.442695, %v1400_v56  ;;  %v2597_v20 = vmul.f32 -1.442695, %v1402_v7  ;;  %2870 = vpow2.f32 %v2594_v11  ;;  %v3613_v11 = vld [vmem:[#allocation6 + $0xc4] ss:$16 sps:$4 sm:$0xff]  }
 0x449   : > { %v3619_v56 = vld [vmem:[#allocation6 + $0xc0] ss:$16 sps:$4 sm:$0xff]   ;;  %v3623_v7 = vld [vmem:[#allocation6 + $0xa4] ss:$16 sps:$4 sm:$0xff]  }
 0x44a   : > { %2872 = vpow2.f32 %v2595_v15  ;;  %v3635_v13 = vld [vmem:[#allocation6 + $0x80] ss:$16 sps:$4 sm:$0xff]  }
 0x44b   : > { %2874 = vpow2.f32 %v2597_v20 }
 0x455   : > { %v2871_v26 = vpop.eup %2870 }
 0x456   : > { %v1415_v55 = vadd.f32 1.0, %v2871_v26 }
 0x457   : > { %v2873_v30 = vpop.eup %2872 }
 0x458   : > { %v2875_v34 = vpop.eup %2874  ;;  %v1416_v22 = vadd.f32 1.0, %v2873_v30 }
 0x459   : > { %v1418_v54 = vadd.f32 1.0, %v2875_v34 }
 0x45b   : > { %2876 = vrcp.f32 %v1418_v54 }
 0x45c   : > { %2878 = vpow2.f32 %v2596_v36 }
 0x45d   : > { %2880 = vrcp.f32 %v1416_v22 }
 0x45e   : > { %2882 = vrcp.f32 %v1415_v55 }
 0x468   : > { %v2877_v53 = vpop.eup %2876 }
 0x469   : > { %v2879_v60 = vpop.eup %2878  ;;  %v1427_v58 = vmul.f32 2.0, %v2877_v53 }
 0x46a   : > { %v2881_v61 = vpop.eup %2880  ;;  %v1417_v4 = vadd.f32 1.0, %v2879_v60 }
 0x46b   : > { %v2598_v52 = vadd.f32 -1.0, %v1427_v58  ;;  %v2883_v63 = vpop.eup %2882  ;;  %v1432_v6 = vmul.f32 %v2881_v61, %v1430_v62 }
 0x46c   : > { %2884 = vrcp.f32 %v1417_v4 }
 0x46d   : > { %v1433_v8 = vmul.f32 %v2883_v63, %v2598_v52 }
 0x46f   : > { %v3606_v10 = vadd.f32 %v1433_v8, %v1432_v6 }
 0x471   : > { %2886 = vtanh.f32 %v3606_v10  ;;  %v1569_v8 = vrot.slane %v3606_v10, 7  ;;  %v3668_v10 = vld [vmem:[#allocation6 + $0xe8] ss:$16 sps:$4 sm:$0xff]  }
 0x479   : > { %v2885_v12 = vpop.eup %2884 }
 0x47e   : > { %v2887_v14 = vpop.eup %2886 }
 0x47f   : > { %v1436_v16 = vmul.f32 %v2887_v14, %v2885_v12 }
 0x481   : > { %1437 = vst [vmem:[#allocation2] sm:$0x8] %v1436_v16  ;;  %v1438_v3 = vpack.c.bf16 %v1436_v16, %v1436_v16 }
 0x483   : > { %v1440_v5 = vshrl.u32 %v1438_v3, 16 }
 0x485   : > { %v1442_v9 = vrot.slane %v1440_v5, 1 }
 0x487   : > { %1477 = vmatmul.mubr.bf16.vlgmr.msra.gmra.mxu0 %v1442_v9  ;;  %1518 = vmatmul.mubr.bf16.vlgmr.msra.gmra.mxu1 %v1442_v9 }
 0x488   : > { %1582 = vmatpush1.bf16.msra.mxu0 %v3609_v57  ;;  %1623 = vmatpush1.bf16.msra.mxu1 %v3376_v37  ;;  %v3627_v37 = vld [vmem:[#allocation6 + $0xa0] ss:$16 sps:$4 sm:$0xff]  }
 0x489   : > { %1583 = vmatprep.subr.bf16.mxu0 %v3613_v11  ;;  %1624 = vmatprep.subr.bf16.mxu1 %v3378_v38  ;;  %v3631_v38 = vld [vmem:[#allocation6 + $0x84] ss:$16 sps:$4 sm:$0xff]  }
 0x48a   : > { %1613 = vmatprep.mubr.bf16.mxu0 %v3146_v0  ;;  %1654 = vmatprep.mubr.bf16.mxu1 %v3146_v0 }
 0x48c   : > { %1584 = vmatpush1.bf16.msra.mxu0 %v3619_v56  ;;  %1625 = vmatpush1.bf16.msra.mxu1 %v3382_v39 }
 0x48d   : > { %1585 = vmatprep.subr.bf16.mxu0 %v3623_v7  ;;  %1626 = vmatprep.subr.bf16.mxu1 %v3385_v40 }
 0x490   : > { %1586 = vmatpush1.bf16.msra.mxu0 %v3627_v37  ;;  %1627 = vmatpush1.bf16.msra.mxu1 %v3394_v41 }
 0x491   : > { %1587 = vmatprep.subr.bf16.mxu0 %v3631_v38  ;;  %1628 = vmatprep.subr.bf16.mxu1 %v3397_v42 }
 0x494   : > { %1588 = vmatpush1.bf16.msra.mxu0 %v3635_v13  ;;  %1629 = vmatpush1.bf16.msra.mxu1 %v3402_v43 }
 0x495   : > { %1589 = vmatprep.subr.bf16.mxu0 %v3343_v18  ;;  %1630 = vmatprep.subr.bf16.mxu1 %v3405_v44  ;;  %v3655_v18 = vld [vmem:[#allocation6 + $0xe4] ss:$16 sps:$4 sm:$0xff]  }
 0x498   : > { %1590 = vmatpush1.bf16.msra.mxu0 %v3346_v21  ;;  %1631 = vmatpush1.bf16.msra.mxu1 %v3410_v45 }
 0x499   : > { %1591 = vmatprep.subr.bf16.mxu0 %v3349_v23  ;;  %1632 = vmatprep.subr.bf16.mxu1 %v3413_v46 }
 0x49c   : > { %1592 = vmatpush1.bf16.msra.mxu0 %v3353_v25  ;;  %1633 = vmatpush1.bf16.msra.mxu1 %v3418_v47 }
 0x49d   : > { %1593 = vmatprep.subr.bf16.mxu0 %v3356_v27  ;;  %1634 = vmatprep.subr.bf16.mxu1 %v3421_v48 }
 0x4a0   : > { %1594 = vmatpush1.bf16.msra.mxu0 %v3360_v29  ;;  %1635 = vmatpush1.bf16.msra.mxu1 %v3426_v49 }
 0x4a1   : > { %1595 = vmatprep.subr.bf16.mxu0 %v3363_v31  ;;  %1636 = vmatprep.subr.bf16.mxu1 %v3429_v50 }
 0x4a4   : > { %1596 = vmatpush1.bf16.msra.mxu0 %v3370_v33  ;;  %1637 = vmatpush1.bf16.msra.mxu1 %v3434_v51 }
 0x4a5   : > { %1720 = vmatprep.subr.bf16.mxu0 %v3655_v18  ;;  %1761 = vmatprep.subr.bf16.mxu1 %v3373_v35 }
 0x547   : > { %v1478_v21 = vpop.f32.mrf.mxu0  ;;  %v1519_v23 = vpop.f32.mrf.mxu1 }
 0x548   : > { %v1530_v25 = vrot.slane %v1478_v21, 4  ;;  %v1532_v36 = vrot.slane %v1519_v23, 4 }
 0x549   : > { %v1480_v27 = vpop.f32.mrf.mxu0  ;;  %v1521_v29 = vpop.f32.mrf.mxu1 }
 0x54a   : > { %v1538_v39 = vadd.f32 %v1530_v25, %v3466_v19  ;;  %v1531_v31 = vrot.slane %v1480_v27, 4  ;;  %v1533_v2 = vrot.slane %v1521_v29, 4  ;;  %v1540_v22 = vadd.f32 %v1532_v36, %v3473_v59 }
 0x54b   : > { %v1482_v15 = vpop.f32.mrf.mxu0  ;;  %v1523_v20 = vpop.f32.mrf.mxu1 }
 0x54c   : > { %v2599_v33 = vmul.f32 -1.442695, %v1538_v39  ;;  %v1539_v32 = vadd.f32 %v1531_v31, %v3464_v17  ;;  %v1541_v24 = vadd.f32 %v1533_v2, %v3470_v28  ;;  %v2601_v60 = vmul.f32 -1.442695, %v1540_v22  ;;  %v3672_v39 = vld [vmem:[#allocation6 + $0xcc] ss:$16 sps:$4 sm:$0xff]  }
 0x54d   : > { %v1483_v26 = vpop.f32.mrf.mxu0  ;;  %v1524_v30 = vpop.f32.mrf.mxu1  ;;  %v3678_v31 = vld [vmem:[#allocation6 + $0xc8] ss:$16 sps:$4 sm:$0xff]   ;;  %v3689_v2 = vld [vmem:[#allocation6 + $0x64] ss:$16 sps:$4 sm:$0xff]   ;;  %v3693_v15 = vld [vmem:[#allocation6 + $0x60] ss:$16 sps:$4 sm:$0xff]  }
 0x54e   : > { %v2600_v34 = vmul.f32 -1.442695, %v1539_v32  ;;  %v2602_v35 = vmul.f32 -1.442695, %v1541_v24  ;;  %2888 = vpow2.f32 %v2599_v33 }
 0x550   : > { %2890 = vpow2.f32 %v2600_v34 }
 0x551   : > { %2892 = vpow2.f32 %v2602_v35 }
 0x55b   : > { %v2889_v54 = vpop.eup %2888 }
 0x55c   : > { %v1554_v62 = vadd.f32 1.0, %v2889_v54 }
 0x55d   : > { %v2891_v55 = vpop.eup %2890 }
 0x55e   : > { %v2893_v53 = vpop.eup %2892  ;;  %v1555_v58 = vadd.f32 1.0, %v2891_v55 }
 0x55f   : > { %v1557_v61 = vadd.f32 1.0, %v2893_v53 }
 0x561   : > { %2894 = vrcp.f32 %v1557_v61 }
 0x562   : > { %2896 = vpow2.f32 %v2601_v60 }
 0x563   : > { %2898 = vrcp.f32 %v1555_v58 }
 0x564   : > { %2900 = vrcp.f32 %v1554_v62 }
 0x56e   : > { %v2895_v52 = vpop.eup %2894 }
 0x56f   : > { %v2897_v63 = vpop.eup %2896  ;;  %v1566_v4 = vmul.f32 2.0, %v2895_v52 }
 0x570   : > { %v2899_v6 = vpop.eup %2898  ;;  %v1556_v16 = vadd.f32 1.0, %v2897_v63 }
 0x571   : > { %v2603_v12 = vadd.f32 -1.0, %v1566_v4  ;;  %v2901_v14 = vpop.eup %2900  ;;  %v1571_v3 = vmul.f32 %v2899_v6, %v1569_v8 }
 0x572   : > { %2902 = vrcp.f32 %v1556_v16 }
 0x573   : > { %v1572_v5 = vmul.f32 %v2901_v14, %v2603_v12 }
 0x575   : > { %v3664_v9 = vadd.f32 %v1572_v5, %v1571_v3 }
 0x577   : > { %2904 = vtanh.f32 %v3664_v9  ;;  %v1706_v16 = vrot.slane %v3664_v9, 7  ;;  %v3008_v9 = vld [vmem:[#allocation6 + $0xac] ss:$16 sps:$4 sm:$0xff]  }
 0x57f   : > { %v2903_v21 = vpop.eup %2902 }
 0x584   : > { %v2905_v23 = vpop.eup %2904 }
 0x585   : > { %v1575_v25 = vmul.f32 %v2905_v23, %v2903_v21 }
 0x587   : > { %1576 = vst [vmem:[#allocation2] sm:$0x10] %v1575_v25  ;;  %v1577_v27 = vpack.c.bf16 %v1575_v25, %v1575_v25 }
 0x589   : > { %v1579_v29 = vrot.slane %v1577_v27, 2 }
 0x58b   : > { %1614 = vmatmul.mubr.bf16.vlgmr.msra.gmra.mxu0 %v1579_v29  ;;  %1655 = vmatmul.mubr.bf16.vlgmr.msra.gmra.mxu1 %v1579_v29 }
 0x58c   : > { %1721 = vmatpush1.bf16.msra.mxu0 %v3609_v57  ;;  %1762 = vmatpush1.bf16.msra.mxu1 %v3668_v10 }
 0x58d   : > { %1722 = vmatprep.subr.bf16.mxu0 %v3613_v11  ;;  %1763 = vmatprep.subr.bf16.mxu1 %v3672_v39 }
 0x58e   : > { %1752 = vmatprep.mubr.bf16.mxu0 %v3146_v0  ;;  %1793 = vmatprep.mubr.bf16.mxu1 %v3146_v0 }
 0x590   : > { %1723 = vmatpush1.bf16.msra.mxu0 %v3619_v56  ;;  %1764 = vmatpush1.bf16.msra.mxu1 %v3678_v31 }
 0x591   : > { %1724 = vmatprep.subr.bf16.mxu0 %v3623_v7  ;;  %1765 = vmatprep.subr.bf16.mxu1 %v3385_v40  ;;  %v3697_v40 = vld [vmem:[#allocation6 + $0x44] ss:$16 sps:$4 sm:$0xff]  }
 0x594   : > { %1725 = vmatpush1.bf16.msra.mxu0 %v3627_v37  ;;  %1766 = vmatpush1.bf16.msra.mxu1 %v3394_v41  ;;  %v3701_v41 = vld [vmem:[#allocation6 + $0x40] ss:$16 sps:$4 sm:$0xff]  }
 0x595   : > { %1726 = vmatprep.subr.bf16.mxu0 %v3631_v38  ;;  %1767 = vmatprep.subr.bf16.mxu1 %v3397_v42  ;;  %v3705_v42 = vld [vmem:[#allocation6 + $0x24] ss:$16 sps:$4 sm:$0xff]  }
 0x598   : > { %1727 = vmatpush1.bf16.msra.mxu0 %v3635_v13  ;;  %1768 = vmatpush1.bf16.msra.mxu1 %v3402_v43  ;;  %v3709_v43 = vld [vmem:[#allocation6 + $0x20] ss:$16 sps:$4 sm:$0xff]  }
 0x599   : > { %1728 = vmatprep.subr.bf16.mxu0 %v3689_v2  ;;  %1769 = vmatprep.subr.bf16.mxu1 %v3405_v44  ;;  %v3713_v44 = vld [vmem:[#allocation6 + $0x4] ss:$16 sps:$4 sm:$0xff]  }
 0x59c   : > { %1729 = vmatpush1.bf16.msra.mxu0 %v3693_v15  ;;  %1770 = vmatpush1.bf16.msra.mxu1 %v3410_v45  ;;  %v3717_v45 = vld [vmem:[#allocation6] ss:$16 sps:$4 sm:$0xff]  }
 0x59d   : > { %1730 = vmatprep.subr.bf16.mxu0 %v3697_v40  ;;  %1771 = vmatprep.subr.bf16.mxu1 %v3413_v46  ;;  %v3007_v46 = vld [vmem:[#allocation6 + $0xec] ss:$16 sps:$4 sm:$0xff]  }
 0x5a0   : > { %1731 = vmatpush1.bf16.msra.mxu0 %v3701_v41  ;;  %1772 = vmatpush1.bf16.msra.mxu1 %v3418_v47 }
 0x5a1   : > { %1732 = vmatprep.subr.bf16.mxu0 %v3705_v42  ;;  %1773 = vmatprep.subr.bf16.mxu1 %v3421_v48 }
 0x5a4   : > { %1733 = vmatpush1.bf16.msra.mxu0 %v3709_v43  ;;  %1774 = vmatpush1.bf16.msra.mxu1 %v3426_v49 }
 0x5a5   : > { %1734 = vmatprep.subr.bf16.mxu0 %v3713_v44  ;;  %1775 = vmatprep.subr.bf16.mxu1 %v3429_v50 }
 0x5a8   : > { %1735 = vmatpush1.bf16.msra.mxu0 %v3717_v45  ;;  %1776 = vmatpush1.bf16.msra.mxu1 %v3434_v51 }
 0x5a9   : > { %1857 = vmatprep.subr.bf16.mxu0 %v3655_v18  ;;  %1898 = vmatprep.subr.bf16.mxu1 %v3007_v46 }
 0x64b   : > { %v1615_v47 = vpop.f32.mrf.mxu0  ;;  %v1656_v48 = vpop.f32.mrf.mxu1 }
 0x64c   : > { %v1667_v20 = vrot.slane %v1615_v47, 3  ;;  %v1669_v55 = vrot.slane %v1656_v48, 3 }
 0x64d   : > { %v1617_v49 = vpop.f32.mrf.mxu0  ;;  %v1658_v33 = vpop.f32.mrf.mxu1 }
 0x64e   : > { %v1675_v32 = vadd.f32 %v1667_v20, %v3466_v19  ;;  %v1668_v24 = vrot.slane %v1617_v49, 3  ;;  %v1670_v26 = vrot.slane %v1658_v33, 3  ;;  %v1677_v53 = vadd.f32 %v1669_v55, %v3473_v59 }
 0x64f   : > { %v1619_v50 = vpop.f32.mrf.mxu0  ;;  %v1660_v30 = vpop.f32.mrf.mxu1 }
 0x650   : > { %v2604_v34 = vmul.f32 -1.442695, %v1675_v32  ;;  %v1676_v35 = vadd.f32 %v1668_v24, %v3464_v17  ;;  %v1678_v51 = vadd.f32 %v1670_v26, %v3470_v28  ;;  %v2606_v62 = vmul.f32 -1.442695, %v1677_v53 }
 0x651   : > { %v1620_v36 = vpop.f32.mrf.mxu0  ;;  %v1661_v18 = vpop.f32.mrf.mxu1 }
 0x652   : > { %v2605_v22 = vmul.f32 -1.442695, %v1676_v35  ;;  %v2607_v54 = vmul.f32 -1.442695, %v1678_v51  ;;  %2906 = vpow2.f32 %v2604_v34 }
 0x654   : > { %2908 = vpow2.f32 %v2605_v22 }
 0x655   : > { %2910 = vpow2.f32 %v2607_v54 }
 0x65f   : > { %v2907_v60 = vpop.eup %2906 }
 0x660   : > { %v1691_v4 = vadd.f32 1.0, %v2907_v60 }
 0x661   : > { %v2909_v58 = vpop.eup %2908 }
 0x662   : > { %v2911_v61 = vpop.eup %2910  ;;  %v1692_v52 = vadd.f32 1.0, %v2909_v58 }
 0x663   : > { %v1694_v63 = vadd.f32 1.0, %v2911_v61 }
 0x665   : > { %2912 = vrcp.f32 %v1694_v63 }
 0x666   : > { %2914 = vpow2.f32 %v2606_v62 }
 0x667   : > { %2916 = vrcp.f32 %v1692_v52 }
 0x668   : > { %2918 = vrcp.f32 %v1691_v4 }
 0x672   : > { %v2913_v6 = vpop.eup %2912 }
 0x673   : > { %v2915_v8 = vpop.eup %2914  ;;  %v1703_v12 = vmul.f32 2.0, %v2913_v6 }
 0x674   : > { %v2917_v14 = vpop.eup %2916  ;;  %v1693_v21 = vadd.f32 1.0, %v2915_v8 }
 0x675   : > { %v2608_v3 = vadd.f32 -1.0, %v1703_v12  ;;  %v2919_v5 = vpop.eup %2918  ;;  %v1708_v23 = vmul.f32 %v2917_v14, %v1706_v16 }
 0x676   : > { %2920 = vrcp.f32 %v1693_v21 }
 0x677   : > { %v1709_v25 = vmul.f32 %v2919_v5, %v2608_v3 }
 0x679   : > { %v3727_v27 = vadd.f32 %v1709_v25, %v1708_v23 }
 0x67b   : > { %2922 = vtanh.f32 %v3727_v27  ;;  %v1845_v6 = vrot.slane %v3727_v27, 7  ;;  %v2808_v27 = vld [vmem:[%s3854_s6 + $0x38] sm:$0xff]  }
 0x683   : > { %v2921_v29 = vpop.eup %2920 }
 0x688   : > { %v2923_v46 = vpop.eup %2922 }
 0x689   : > { %v1712_v47 = vmul.f32 %v2923_v46, %v2921_v29 }
 0x68b   : > { %1713 = vst [vmem:[#allocation2] sm:$0x20] %v1712_v47  ;;  %v1714_v48 = vpack.c.bf16 %v1712_v47, %v1712_v47  ;;  %v3147_v47 = vmov 0.0  }
 0x68d   : > { %v1716_v20 = vshrl.u32 %v1714_v48, 16  ;;  %v2809_v48 = vld [vmem:[%s3854_s6 + $0x30] sm:$0xff]  }
 0x68f   : > { %v1718_v49 = vrot.slane %v1716_v20, 2  ;;  %v2810_v20 = vld [vmem:[%s3854_s6 + $0x28] sm:$0xff]  }
 0x691   : > { %1753 = vmatmul.mubr.bf16.vlgmr.msra.gmra.mxu0 %v1718_v49  ;;  %1794 = vmatmul.mubr.bf16.vlgmr.msra.gmra.mxu1 %v1718_v49  ;;  %v2811_v49 = vld [vmem:[%s3854_s6 + $0x20] sm:$0xff]  }
 0x692   : > { %1858 = vmatpush1.bf16.msra.mxu0 %v3609_v57  ;;  %1899 = vmatpush1.bf16.msra.mxu1 %v3668_v10  ;;  %v3009_v57 = vld [vmem:[#allocation6 + $0xa8] ss:$16 sps:$4 sm:$0xff]  }
 0x693   : > { %1859 = vmatprep.subr.bf16.mxu0 %v3613_v11  ;;  %1900 = vmatprep.subr.bf16.mxu1 %v3672_v39  ;;  %v3010_v11 = vld [vmem:[#allocation6 + $0x8c] ss:$16 sps:$4 sm:$0xff]   ;;  %v3011_v10 = vld [vmem:[#allocation6 + $0x88] ss:$16 sps:$4 sm:$0xff]  }
 0x694   : > { %1889 = vmatprep.mubr.bf16.mxu0 %v3146_v0  ;;  %1930 = vmatprep.mubr.bf16.mxu1 %v3146_v0  ;;  %v3012_v0 = vld [vmem:[#allocation6 + $0x6c] ss:$16 sps:$4 sm:$0xff]  }
 0x695   : > { %v3018_v39 = vld [vmem:[#allocation6 + $0xc] ss:$16 sps:$4 sm:$0xff]  }
 0x696   : > { %1860 = vmatpush1.bf16.msra.mxu0 %v3619_v56  ;;  %1901 = vmatpush1.bf16.msra.mxu1 %v3678_v31  ;;  %v3013_v56 = vld [vmem:[#allocation6 + $0x68] ss:$16 sps:$4 sm:$0xff]  }
 0x697   : > { %1861 = vmatprep.subr.bf16.mxu0 %v3623_v7  ;;  %1902 = vmatprep.subr.bf16.mxu1 %v3008_v9  ;;  %v3014_v7 = vld [vmem:[#allocation6 + $0x4c] ss:$16 sps:$4 sm:$0xff]   ;;  %v3019_v31 = vld [vmem:[#allocation6 + $0x8] ss:$16 sps:$4 sm:$0xff]   ;;  %v2812_v9 = vld [vmem:[%s3854_s6 + $0x18] sm:$0xff]  }
 0x69a   : > { %1862 = vmatpush1.bf16.msra.mxu0 %v3627_v37  ;;  %1903 = vmatpush1.bf16.msra.mxu1 %v3009_v57  ;;  %v3015_v37 = vld [vmem:[#allocation6 + $0x48] ss:$16 sps:$4 sm:$0xff]  }
 0x69b   : > { %1863 = vmatprep.subr.bf16.mxu0 %v3631_v38  ;;  %1904 = vmatprep.subr.bf16.mxu1 %v3010_v11  ;;  %v3016_v38 = vld [vmem:[#allocation6 + $0x2c] ss:$16 sps:$4 sm:$0xff]   ;;  %v2814_v11 = vld [vmem:[%s3854_s6 + $0x8] sm:$0xff]  }
 0x69c   : > { %v2813_v57 = vld [vmem:[%s3854_s6 + $0x10] sm:$0xff]  }
 0x69e   : > { %1864 = vmatpush1.bf16.msra.mxu0 %v3635_v13  ;;  %1905 = vmatpush1.bf16.msra.mxu1 %v3011_v10  ;;  %v3017_v13 = vld [vmem:[#allocation6 + $0x28] ss:$16 sps:$4 sm:$0xff]  }
 0x69f   : > { %1865 = vmatprep.subr.bf16.mxu0 %v3689_v2  ;;  %1906 = vmatprep.subr.bf16.mxu1 %v3012_v0  ;;  %v2815_v10 = vld [vmem:[%s3854_s6] sm:$0xff]  }
 0x6a2   : > { %1866 = vmatpush1.bf16.msra.mxu0 %v3693_v15  ;;  %1907 = vmatpush1.bf16.msra.mxu1 %v3013_v56 }
 0x6a3   : > { %1867 = vmatprep.subr.bf16.mxu0 %v3697_v40  ;;  %1908 = vmatprep.subr.bf16.mxu1 %v3014_v7 }
 0x6a6   : > { %1868 = vmatpush1.bf16.msra.mxu0 %v3701_v41  ;;  %1909 = vmatpush1.bf16.msra.mxu1 %v3015_v37 }
 0x6a7   : > { %1869 = vmatprep.subr.bf16.mxu0 %v3705_v42  ;;  %1910 = vmatprep.subr.bf16.mxu1 %v3016_v38 }
 0x6aa   : > { %1870 = vmatpush1.bf16.msra.mxu0 %v3709_v43  ;;  %1911 = vmatpush1.bf16.msra.mxu1 %v3017_v13 }
 0x6ab   : > { %1871 = vmatprep.subr.bf16.mxu0 %v3713_v44  ;;  %1912 = vmatprep.subr.bf16.mxu1 %v3018_v39 }
 0x6ae   : > { %1872 = vmatpush1.bf16.msra.mxu0 %v3717_v45  ;;  %1913 = vmatpush1.bf16.msra.mxu1 %v3019_v31 }
 0x6af   : > { %2645 = vmatprep.subr.bf16.mxu0 %v3147_v47  ;;  %2665 = vmatprep.subr.mxu1 %v3147_v47 }
 0x751   : > { %v1754_v2 = vpop.f32.mrf.mxu0  ;;  %v1795_v15 = vpop.f32.mrf.mxu1 }
 0x752   : > { %v1806_v40 = vrot.slane %v1754_v2, 2  ;;  %v1808_v36 = vrot.slane %v1795_v15, 2 }
 0x753   : > { %v1756_v41 = vpop.f32.mrf.mxu0  ;;  %v1797_v33 = vpop.f32.mrf.mxu1 }
 0x754   : > { %v1814_v42 = vadd.f32 %v1806_v40, %v3466_v19  ;;  %v1807_v32 = vrot.slane %v1756_v41, 2  ;;  %v1809_v24 = vrot.slane %v1797_v33, 2  ;;  %v1816_v18 = vadd.f32 %v1808_v36, %v3473_v59 }
 0x755   : > { %v1758_v43 = vpop.f32.mrf.mxu0  ;;  %v1799_v26 = vpop.f32.mrf.mxu1 }
 0x756   : > { %v2609_v50 = vmul.f32 -1.442695, %v1814_v42  ;;  %v1815_v44 = vadd.f32 %v1807_v32, %v3464_v17  ;;  %v1817_v30 = vadd.f32 %v1809_v24, %v3470_v28  ;;  %v2611_v53 = vmul.f32 -1.442695, %v1816_v18 }
 0x757   : > { %v1759_v34 = vpop.f32.mrf.mxu0  ;;  %v1800_v45 = vpop.f32.mrf.mxu1 }
 0x758   : > { %v2610_v35 = vmul.f32 -1.442695, %v1815_v44  ;;  %v2612_v51 = vmul.f32 -1.442695, %v1817_v30  ;;  %2924 = vpow2.f32 %v2609_v50 }
 0x75a   : > { %2926 = vpow2.f32 %v2610_v35 }
 0x75b   : > { %2928 = vpow2.f32 %v2612_v51 }
 0x765   : > { %v2925_v22 = vpop.eup %2924 }
 0x766   : > { %v1830_v61 = vadd.f32 1.0, %v2925_v22 }
 0x767   : > { %v2927_v54 = vpop.eup %2926 }
 0x768   : > { %v2929_v55 = vpop.eup %2928  ;;  %v1831_v60 = vadd.f32 1.0, %v2927_v54 }
 0x769   : > { %v1833_v58 = vadd.f32 1.0, %v2929_v55 }
 0x76b   : > { %2930 = vrcp.f32 %v1833_v58 }
 0x76c   : > { %2932 = vpow2.f32 %v2611_v53 }
 0x76d   : > { %2934 = vrcp.f32 %v1831_v60 }
 0x76e   : > { %2936 = vrcp.f32 %v1830_v61 }
 0x778   : > { %v2931_v62 = vpop.eup %2930 }
 0x779   : > { %v2933_v52 = vpop.eup %2932  ;;  %v1842_v63 = vmul.f32 2.0, %v2931_v62 }
 0x77a   : > { %v2935_v4 = vpop.eup %2934  ;;  %v1832_v14 = vadd.f32 1.0, %v2933_v52 }
 0x77b   : > { %v2613_v8 = vadd.f32 -1.0, %v1842_v63  ;;  %v2937_v12 = vpop.eup %2936  ;;  %v1847_v16 = vmul.f32 %v2935_v4, %v1845_v6  ;;  %v2619_v6 = vld [vmem:[%s3855_s7] ss:$0 sm:$0xff] }
 0x77c   : > { %2938 = vrcp.f32 %v1832_v14 }
 0x77d   : > { %v1848_v3 = vmul.f32 %v2937_v12, %v2613_v8 }
 0x77f   : > { %v3755_v5 = vadd.f32 %v1848_v3, %v1847_v16 }
 0x781   : > { %2940 = vtanh.f32 %v3755_v5  ;;  %v1982_v22 = vrot.slane %v3755_v5, 7  ;;  %v2115_v5 = vand.u32 127, %v530_v1 }
 0x783   : > { %vm2116_vm2 = vcmp.lt.s32.totalorder %v2115_v5, 32 }
 0x789   : > { %v2939_v21 = vpop.eup %2938 }
 0x78e   : > { %v2941_v23 = vpop.eup %2940 }
 0x78f   : > { %v1851_v25 = vmul.f32 %v2941_v23, %v2939_v21  ;;  %v2628_v21 = vld [vmem:[%s3856_s8] ss:$0 sm:$0xff] }
 0x791   : > { %1852 = vst [vmem:[#allocation2] sm:$0x40] %v1851_v25  ;;  %v1853_v29 = vpack.c.bf16 %v1851_v25, %v1851_v25 }
 0x793   : > { %v1855_v46 = vrot.slane %v1853_v29, 3 }
 0x795   : > { %1890 = vmatmul.mubr.bf16.vlgmr.msra.gmra.mxu0 %v1855_v46  ;;  %1931 = vmatmul.mubr.bf16.vlgmr.msra.gmra.mxu1 %v1855_v46 }
 0x796   : > { %2646 = vmatpush3.bf16.msra.mxu0 %v2808_v27  ;;  %2661 = vmatprep.mubr.msk.bf16.mxu0 %vm3148_vm1, %v3147_v47 }
 0x797   : > { %2647 = vmatprep.subr.bf16.mxu0 %v3147_v47  ;;  %2667 = vmatprep.mubr.msk.f32.mxu1 %vm3148_vm1, %v3147_v47  ;;  %vm2262_vm1 = vcmask 31744  }
 0x79a   : > { %2648 = vmatpush3.bf16.msra.mxu0 %v2809_v48 }
 0x79b   : > { %2649 = vmatprep.subr.bf16.mxu0 %v3147_v47 }
 0x79e   : > { %2650 = vmatpush3.bf16.msra.mxu0 %v2810_v20 }
 0x79f   : > { %2651 = vmatprep.subr.bf16.mxu0 %v3147_v47 }
 0x7a2   : > { %2652 = vmatpush3.bf16.msra.mxu0 %v2811_v49 }
 0x7a3   : > { %2653 = vmatprep.subr.bf16.mxu0 %v3147_v47 }
 0x7a6   : > { %2654 = vmatpush3.bf16.msra.mxu0 %v2812_v9 }
 0x7a7   : > { %2655 = vmatprep.subr.bf16.mxu0 %v3147_v47 }
 0x7aa   : > { %2656 = vmatpush3.bf16.msra.mxu0 %v2813_v57 }
 0x7ab   : > { %2657 = vmatprep.subr.bf16.mxu0 %v3147_v47 }
 0x7ae   : > { %2658 = vmatpush3.bf16.msra.mxu0 %v2814_v11 }
 0x7af   : > { %2659 = vmatprep.subr.bf16.mxu0 %v3147_v47 }
 0x7b2   : > { %2660 = vmatpush3.bf16.msra.mxu0 %v2815_v10 }
 0x855   : > { %v1891_v0 = vpop.f32.mrf.mxu0  ;;  %v1932_v56 = vpop.f32.mrf.mxu1 }
 0x856   : > { %v1943_v7 = vrot.slane %v1891_v0, 1  ;;  %v1945_v26 = vrot.slane %v1932_v56, 1 }
 0x857   : > { %v1893_v37 = vpop.f32.mrf.mxu0  ;;  %v1934_v38 = vpop.f32.mrf.mxu1 }
 0x858   : > { %v1951_v13 = vadd.f32 %v1943_v7, %v3466_v19  ;;  %v1944_v39 = vrot.slane %v1893_v37, 1  ;;  %v1946_v31 = vrot.slane %v1934_v38, 1  ;;  %v1953_v50 = vadd.f32 %v1945_v26, %v3473_v59 }
 0x859   : > { %v1895_v2 = vpop.f32.mrf.mxu0  ;;  %v1936_v15 = vpop.f32.mrf.mxu1 }
 0x85a   : > { %v2614_v40 = vmul.f32 -1.442695, %v1951_v13  ;;  %v1952_v41 = vadd.f32 %v1944_v39, %v3464_v17  ;;  %v1954_v33 = vadd.f32 %v1946_v31, %v3470_v28  ;;  %v2616_v34 = vmul.f32 -1.442695, %v1953_v50 }
 0x85b   : > { %v1896_v42 = vpop.f32.mrf.mxu0  ;;  %v1937_v32 = vpop.f32.mrf.mxu1 }
 0x85c   : > { %v2615_v24 = vmul.f32 -1.442695, %v1952_v41  ;;  %v2617_v43 = vmul.f32 -1.442695, %v1954_v33  ;;  %2942 = vpow2.f32 %v2614_v40 }
 0x85e   : > { %2944 = vpow2.f32 %v2615_v24 }
 0x85f   : > { %2946 = vpow2.f32 %v2617_v43 }
 0x869   : > { %v2943_v19 = vpop.eup %2942 }
 0x86a   : > { %v1967_v17 = vadd.f32 1.0, %v2943_v19 }
 0x86b   : > { %v2945_v44 = vpop.eup %2944 }
 0x86c   : > { %v2947_v30 = vpop.eup %2946  ;;  %v1968_v45 = vadd.f32 1.0, %v2945_v44 }
 0x86d   : > { %v1970_v35 = vadd.f32 1.0, %v2947_v30 }
 0x86f   : > { %2948 = vrcp.f32 %v1970_v35 }
 0x870   : > { %2950 = vpow2.f32 %v2616_v34 }
 0x871   : > { %2952 = vrcp.f32 %v1968_v45 }
 0x872   : > { %2954 = vrcp.f32 %v1967_v17 }
 0x87c   : > { %v2949_v28 = vpop.eup %2948 }
 0x87d   : > { %v2951_v51 = vpop.eup %2950  ;;  %v1979_v36 = vmul.f32 2.0, %v2949_v28 }
 0x87e   : > { %v2953_v18 = vpop.eup %2952  ;;  %v1969_v55 = vadd.f32 1.0, %v2951_v51 }
 0x87f   : > { %v2618_v59 = vadd.f32 -1.0, %v1979_v36  ;;  %v2955_v54 = vpop.eup %2954  ;;  %v1984_v53 = vmul.f32 %v2953_v18, %v1982_v22 }
 0x880   : > { %2956 = vrcp.f32 %v1969_v55 }
 0x881   : > { %v1985_v60 = vmul.f32 %v2955_v54, %v2618_v59 }
 0x883   : > { %v1986_v58 = vadd.f32 %v1985_v60, %v1984_v53 }
 0x885   : > { %2958 = vtanh.f32 %v1986_v58  ;;  %1991 = vst [vmem:[%s509_s14 - $0x7] sm:$0x80] %v1986_v58  ;;  %s3150_s14 = smov [#allocation8]  }
 0x886   : > { %s3076_s17 = sshll.u32 %s3150_s14, 4  ;;  %s3077_s17 = int_to_ptr.vmem [resolvable:$false] %s3076_s17 }
 0x887   : > { %p3079_p11 = scmp.lt.s32.totalorder %s2382_s30, %s3077_s17 }
 0x88d   : > { %v2957_v61 = vpop.eup %2956 }
 0x892   : > { %v2959_v62 = vpop.eup %2958 }
 0x893   : > { %v1988_v52 = vmul.f32 %v2959_v62, %v2957_v61 }
 0x895   : > { %1989 = vst [vmem:[#allocation2] sm:$0x80] %v1988_v52  ;;  %1990 = vst [vmem:[%s506_s22 - $0x7] sm:$0x80] %v1988_v52  ;;  %s2631_s22 = sshll.u32 %s3242_s29, 4  ;;  %s3078_s29 = scalar_lea.vmem %s3077_s17, 32 }
 0x896   : > { %p3080_p0 = scmp.lt.s32.totalorder %s3078_s29, %s3072_s15 }
 0x898   : > { %p3081_p1 = por %p3080_p0, %p3079_p11 }
 0x89a   : > { %p3082_p3 = pnand %p3081_p1, %p3075_p8 }
 0x89c   : > { %v1992_v63 = vld [vmem:[#allocation2] sm:$0xff] }
 0x89d   : > { %v1993_v4 = vpack.c.bf16 %v1992_v63, %v1992_v63 }
 0x89f   : > { %2662 = vmatmul.mubr.bf16.vlgmr.msra.gmra.mxu0 %v1993_v4 }
 0x95f   : > { %v2099_v8 = vpop.f32.mrf.mxu0 }
 0x960   : > { %v2100_v12 = vadd.f32 %v2619_v6, %v2099_v8 }
 0x961   : > { %v2663_v14 = vpop.f32.mrf.mxu0 }
 0x962   : > { %2960 = vtanh.f32 %v2100_v12 }
 0x963   : > { %v2102_v16 = vpop.f32.mrf.mxu0 }
 0x965   : > { %v2664_v3 = vpop.f32.mrf.mxu0 }
 0x96f   : > { %v2961_v23 = vpop.eup %2960 }
 0x970   : > { %v2113_v25 = vmul.f32 %v2961_v23, %v2628_v21 }
 0x972   : > { %v2117_v29 = vsel %vm2116_vm2, %v2113_v25, 0.0  ;;  %v2120_v46 = vsel %vm2116_vm2, 0.0, %v2113_v25 }
 0x973   : > { %2118 = vadd.xlane.f32.xlu0 %v2117_v29 }
 0x977   : > { %2121 = vadd.xlane.f32.xlu0 %v2120_v46 }
 0x9fc   : > { %v2119_v27 = vpop.xlane.xlu0 %2118 }
 0x9fd   : > { %v2123_v47 = vrot.slane %v2119_v27, 4 }
 0x9ff   : > { %v2124_v48 = vmax.f32 %v2119_v27, %v2123_v47 }
 0xa00   : > { %v2122_v20 = vpop.xlane.xlu0 %2121 }
 0xa01   : > { %v2125_v49 = vrot.slane %v2124_v48, 2  ;;  %v2140_v9 = vrot.slane %v2122_v20, 4 }
 0xa03   : > { %v2126_v1 = vmax.f32 %v2124_v48, %v2125_v49  ;;  %v2141_v57 = vmax.f32 %v2122_v20, %v2140_v9  ;;  %v2268_v48 = vld [vmem:[%s3857_s9] sm:$0x7f] }
 0xa04   : > { %2666 = vmatpush3.msk.msra.mxu1 %vm2274_vm9, %v2268_v48 }
 0xa05   : > { %v2127_v11 = vrot.slane %v2126_v1, 1  ;;  %v2142_v10 = vrot.slane %v2141_v57, 2 }
 0xa07   : > { %v2128_v0 = vmax.f32 %v2126_v1, %v2127_v11  ;;  %v2143_v56 = vmax.f32 %v2141_v57, %v2142_v10 }
 0xa09   : > { %v2129_v7 = vsub.f32 %v2119_v27, %v2128_v0  ;;  %v2144_v37 = vrot.slane %v2143_v56, 1 }
 0xa0b   : > { %v2130_v38 = vmul.f32 1.442695, %v2129_v7  ;;  %v2145_v13 = vmax.f32 %v2143_v56, %v2144_v37 }
 0xa0d   : > { %2962 = vpow2.f32 %v2130_v38  ;;  %v2146_v39 = vsub.f32 %v2122_v20, %v2145_v13 }
 0xa0f   : > { %v2147_v31 = vmul.f32 1.442695, %v2146_v39 }
 0xa11   : > { %2964 = vpow2.f32 %v2147_v31 }
 0xa1a   : > { %v2963_v2 = vpop.eup %2962 }
 0xa1b   : > { %v2132_v15 = vrot.slane %v2963_v2, 4 }
 0xa1d   : > { %v2133_v40 = vadd.f32 %v2963_v2, %v2132_v15 }
 0xa1e   : > { %v2965_v41 = vpop.eup %2964 }
 0xa1f   : > { %v2134_v33 = vrot.slane %v2133_v40, 2  ;;  %v2149_v42 = vrot.slane %v2965_v41, 4 }
 0xa21   : > { %v2135_v32 = vadd.f32 %v2134_v33, %v2133_v40  ;;  %v2150_v24 = vadd.f32 %v2965_v41, %v2149_v42 }
 0xa23   : > { %v2136_v43 = vrot.slane %v2135_v32, 1  ;;  %v2151_v26 = vrot.slane %v2150_v24, 2 }
 0xa25   : > { %v2152_v50 = vadd.f32 %v2151_v26, %v2150_v24  ;;  %v2137_v19 = vadd.f32 %v2136_v43, %v2135_v32 }
 0xa27   : > { %v2153_v44 = vrot.slane %v2152_v50, 1  ;;  %2966 = vrcp.f32 %v2137_v19 }
 0xa29   : > { %v2154_v30 = vadd.f32 %v2153_v44, %v2152_v50 }
 0xa2b   : > { %2968 = vrcp.f32 %v2154_v30 }
 0xa34   : > { %v2967_v34 = vpop.eup %2966 }
 0xa35   : > { %v2139_v35 = vmul.f32 %v2967_v34, %v2963_v2 }
 0xa38   : > { %v2969_v45 = vpop.eup %2968 }
 0xa39   : > { %v2156_v17 = vmul.f32 %v2969_v45, %v2965_v41 }
 0xa3b   : > { %v2157_v28 = vsel %vm2116_vm2, %v2139_v35, %v2156_v17  ;;  %vm2264_vm2 = vcmask 39936  }
 0xa3c   : > { %v2158_v51 = vmul.f32 %v2157_v28, %v1992_v63 }
 0xa3e   : > { %v2159_v36 = vrot.slane %v2158_v51, 4 }
 0xa40   : > { %v2160_v18 = vadd.f32 %v2159_v36, %v2158_v51 }
 0xa42   : > { %v2161_v22 = vrot.slane %v2160_v18, 2 }
 0xa44   : > { %v2162_v59 = vadd.f32 %v2161_v22, %v2160_v18  ;;  %v2269_v22 = vld [vmem:[%s3858_s10] sm:$0x1] }
 0xa46   : > { %v2163_v54 = vrot.slane %v2162_v59, 1 }
 0xa48   : > { %v2164_v55 = vadd.f32 %v2163_v54, %v2162_v59 }
 0xa4a   : > { %v2174_v53 = vand.u32 2147483647, %v2164_v55  ;;  %v2172_v60 = vmul.f32 %v2164_v55, %v2164_v55 }
 0xa4c   : > { %2176 = vrot.lane.b32.xlu1 %v2174_v53, %s3149_s21  ;;  %2184 = vrot.lane.b32.xlu0 %v2172_v60, %s3149_s21 }
 0xa50   : > { %2166 = vrot.lane.b32.xlu1 %v2164_v55, %s3149_s21  ;;  %s2379_s21 = scalar_lea.hbm %s3859_s11, %s2631_s22 }
 0xabe   : > { %v2177_v58 = vpop.permute.xlu1 %2176  ;;  %v2185_v16 = vpop.permute.xlu0 %2184 }
 0xabf   : > { %v2179_v61 = vadd.f32 %v2177_v58, %v2174_v53 }
 0xac1   : > { %v2180_v62 = vadd.f32 1e-08, %v2179_v61 }
 0xac2   : > { %v2167_v52 = vpop.permute.xlu1 %2166 }
 0xac3   : > { %2970 = vrcp.f32 %v2180_v62  ;;  %v2169_v4 = vsub.f32 %v2164_v55, %v2167_v52  ;;  %v2171_v6 = vmul.f32 %v2167_v52, %v2164_v55 }
 0xac5   : > { %v2173_v63 = vmul.f32 %v2169_v4, %v2169_v4  ;;  %v2170_v8 = vand.u32 2147483647, %v2169_v4  ;;  %v2197_v14 = vsel %vm2196_vm3, %v2171_v6, %v2172_v60  ;;  %vm2266_vm3 = vcmask 48128  }
 0xac6   : > { %v2199_v21 = vsel %vm2198_vm4, %v2197_v14, %v2185_v16  ;;  %vm2270_vm4 = vcmask 56320  }
 0xac7   : > { %v2188_v12 = vrot.slane %v2173_v63, 5  ;;  %v2191_v5 = vrot.slane %v2170_v8, 4 }
 0xac9   : > { %v2201_v25 = vsel %vm2200_vm5, %v2199_v21, %v2188_v12  ;;  %vm2348_vm5 = vcmask 16384  }
 0xaca   : > { %v2203_v46 = vsel %vm2202_vm6, %v2201_v25, %v2191_v5 }
 0xad0   : > { %v2971_v3 = vpop.eup %2970 }
 0xad1   : > { %v2182_v23 = vmul.f32 %v2971_v3, %v2173_v63 }
 0xad3   : > { %v2194_v29 = vrot.slane %v2182_v23, 3 }
 0xad5   : > { %v2205_v27 = vsel %vm2204_vm7, %v2203_v46, %v2194_v29 }
 0xad6   : > { %v2207_v47 = vsel %vm2206_vm8, %v2205_v27, 0.0 }
 0xad7   : > { %2208 = vadd.xlane.f32.xlu1 %v2207_v47 }
 0xb60   : > { %v2209_v20 = vpop.xlane.xlu1 %2208 }
 0xb61   : > { %v2211_v49 = vrot.slane %v2209_v20, 1  ;;  %v2227_v1 = vadd.f32 1e-08, %v2209_v20  ;;  %v2238_v11 = vsub.f32 0.0, %v2209_v20  ;;  %v2235_v13 = vmul.f32 0.03125, %v2209_v20 }
 0xb63   : > { %v2213_v9 = vmul.f32 %v2211_v49, %v2209_v20  ;;  %v2241_v37 = vmul.f32 0.03125, %v2238_v11  ;;  %v2239_v31 = vmul.f32 1.442695, %v2238_v11  ;;  %v2236_v40 = vadd.f32 1.0, %v2235_v13 }
 0xb64   : > { %vm2230_vm12 = vcmp.eq.f32.partialorder %v2227_v1, inf  ;;  %v2233_v42 = vand.u32 2147483648, %v2227_v1  ;;  %vm2232_vm13 = vcmp.eq.f32.partialorder %v2227_v1, 0.0  ;;  %v2248_v44 = vrot.slane %v2235_v13, 4 }
 0xb65   : > { %2972 = vrsqrt.f32 %v2213_v9  ;;  %vm2216_vm10 = vcmp.eq.f32.partialorder %v2213_v9, inf  ;;  %v2219_v0 = vand.u32 2147483648, %v2213_v9  ;;  %vm2218_vm11 = vcmp.eq.f32.partialorder %v2213_v9, 0.0 }
 0xb66   : > { %2974 = vrsqrt.f32 %v2227_v1  ;;  %v2242_v2 = vmul.f32 1.442695, %v2241_v37 }
 0xb72   : > { %v2973_v57 = vpop.eup %2972 }
 0xb73   : > { %v2215_v10 = vmul.f32 %v2973_v57, %v2213_v9  ;;  %v2975_v15 = vpop.eup %2974 }
 0xb74   : > { %v2229_v41 = vmul.f32 %v2975_v15, %v2227_v1 }
 0xb75   : > { %v2217_v56 = vsel %vm2216_vm10, %v2213_v9, %v2215_v10 }
 0xb76   : > { %v2220_v7 = vsel %vm2218_vm11, %v2219_v0, %v2217_v56  ;;  %v2231_v33 = vsel %vm2230_vm12, %v2227_v1, %v2229_v41 }
 0xb77   : > { %v2221_v38 = vmax.f32 %v2220_v7, 1e-08  ;;  %v2234_v32 = vsel %vm2232_vm13, %v2233_v42, %v2231_v33 }
 0xb78   : > { %v2245_v26 = vrot.slane %v2234_v32, 3 }
 0xb79   : > { %v2223_v39 = vrot.slane %v2221_v38, 1 }
 0xb7b   : > { %2976 = vrcp.f32 %v2223_v39 }
 0xb7c   : > { %2978 = vpow2.f32 %v2239_v31 }
 0xb7d   : > { %2980 = vpow2.f32 %v2242_v2 }
 0xb7e   : > { %2982 = vtanh.f32 %v2236_v40 }
 0xb88   : > { %v2977_v24 = vpop.eup %2976 }
 0xb89   : > { %v2226_v43 = vmul.f32 %v2977_v24, %v2209_v20  ;;  %v2979_v50 = vpop.eup %2978 }
 0xb8a   : > { %v2981_v19 = vpop.eup %2980  ;;  %v2251_v35 = vrot.slane %v2979_v50, 5 }
 0xb8b   : > { %v2257_v30 = vsel %vm2256_vm14, %v2226_v43, %v2245_v26  ;;  %v2983_v45 = vpop.eup %2982  ;;  %v2254_v28 = vrot.slane %v2981_v19, 3 }
 0xb8c   : > { %v2259_v34 = vsel %vm2258_vm15, %v2257_v30, %v2209_v20 }
 0xb8d   : > { %v2261_v17 = vsel %vm2260_vm0, %v2259_v34, %v2248_v44 }
 0xb8e   : > { %v2263_v51 = vsel %vm2262_vm1, %v2261_v17, %v2983_v45 }
 0xb8f   : > { %v2265_v36 = vsel %vm2264_vm2, %v2263_v51, %v2251_v35 }
 0xb90   : > { %v2267_v18 = vsel %vm2266_vm3, %v2265_v36, %v2254_v28 }
 0xb91   : > { %2668 = vmatmul.mubr.msk.f32.vlgmr.msra.gmra.mxu1 %vm2270_vm4, %v2267_v18 }
 0xc51   : > { %v2344_v59 = vpop.f32.mrf.mxu1 }
 0xc52   : > { %v2345_v54 = vadd.f32 %v2344_v59, %v2269_v22 }
 0xc53   : > { %v2669_v55 = vpop.f32.mrf.mxu1 }
 0xc54   : > { %v2349_v53 = vsel %vm2348_vm5, %v2345_v54, -inf }
 0xc55   : > { %2350 = vmax.xlane.f32.xlu0 %v2349_v53 }
 0xcde   : > { %v2351_v60 = vpop.xlane.xlu0 %2350 }
 0xcdf   : > { %v2352_v58 = vsub.f32 %v2345_v54, %v2351_v60 }
 0xce1   : > { %v2353_v61 = vmul.f32 1.442695, %v2352_v58 }
 0xce3   : > { %2984 = vpow2.f32 %v2353_v61 }
 0xcf0   : > { %v2985_v62 = vpop.eup %2984 }
 0xcf1   : > { %v2355_v52 = vsel %vm2348_vm5, %v2985_v62, 0.0 }
 0xcf2   : > { %2356 = vadd.xlane.f32.xlu1 %v2355_v52 }
 0xd7b   : > { %v2357_v4 = vpop.xlane.xlu1 %2356 }
 0xd7c   : > { %2986 = vlog2.f32 %v2357_v4 }
 0xd89   : > { %v2987_v6 = vpop.eup %2986 }
 0xd8a   : > { %v2359_v63 = vmul.f32 0.6931472, %v2987_v6 }
 0xd8c   : > { %v2360_v8 = vsub.f32 %v2352_v58, %v2359_v63 }
 0xd8e   : > { %2361 = vst.msk [vmem:[%s483_s23] sm:$0x1] %vm2348_vm5, %v2360_v8 }
 0xd8f   : > { %3085 = shalt.err (!%p3082_p3)
}
 0xd90   : > { %s3086_s16 = scalar_lea.hbm %s2379_s21, 16  ;;  %s3090_s23 = scalar_lea.hbm %s3859_s11, 32 }
 0xd91   : > { %p3087_p2 = scmp.ne.s32.totalorder %s2379_s21, %s3086_s16  ;;  %p3091_p7 = scmp.lt.s32.totalorder %s2379_s21, %s3859_s11 }
 0xd92   : > { %p3092_p6 = scmp.lt.s32.totalorder %s3090_s23, %s3086_s16 }
 0xd93   : > { %p3088_p4 = pnand %p3087_p2, %p3259_p5 }
 0xd94   : > { %p3093_p9 = por %p3092_p6, %p3091_p7 }
 0xd95   : > { %p3089_p13 = pneg %p3088_p4 }
 0xd97   : > { %p3094_p10 = pnand %p3093_p9, %p3089_p13 }
 0xd99   : > { %3097 = shalt.err (!%p3094_p10)
}
 0xd9a   : > { %2678 = dma.vmem_to_hbm [thread:$0]  (%p3259_p5), %s2382_s30, 16, %s2379_s21, %s2363_s24  }
 0xd9b PF: > { %p2695_p12 = scmp.ge.s32.totalorder %s3140_s28, 2  ;;  %s2399_s15 = sand.u32 1, %s3128_s25  }
 0xd9c   : > { %p3879_p8 = scmp.ne.s32.totalorder %s3871_s19, 0  ;;  %s2400_s14 = scalar_lea.sflag [#allocation5], %s2399_s15 }
 0xd9e   : > { %p2688_p11 = pnand %p2695_p12, %p3879_p8 }
 0xda0   : > { %p2689_p0 = pneg %p2688_p11 }
 0xda2   : > { %3123 = dma.done.wait (%p2689_p0), %s2400_s14, 16  }
 0xda3   : > { %3125 = vsyncadd (%p2689_p0), %s2400_s14, 4294967280  ;;  %s3880_s28 = sld [smem:[#allocation13_spill]]  ;;  %s3883_s25 = smov %s3132_s26 }
 0xda4   : > { %s3881_s0 = sld [smem:[#allocation12_spill]] }
 0xda5   : > { %s3882_s27 = sld [smem:[#allocation14_spill]] }
 0xda9   : > { %p26_p1 = scmp.ge.s32.totalorder %s3880_s28, 4  }
 0xdaa   : > { %s3884_s26 = smov %s3881_s0 }
 0xdab   :  { %28 = sbr.rel (!%p26_p1) target bundleno = 7 (0x7), region = 138 }
 0xdb0   :  { %2416 = vsyncpa [#allocation4], 1 }
 0xdb1   :  { %2418 = vsyncpa [#allocation4 + $0x1], 1 }
 0xdb2   :  { %2419 = vsyncpa [#allocation7], 1 }
 0xdb3   :  { %2420 = vsyncpa [#allocation5], 1 }
 0xdb4   :  { %2422 = vsyncpa [#allocation5 + $0x1], 1 }

</bundles_post_ra>
